<compile_context>
chip_gen: v6e
topology: v6e:2x2x1
jax: 0.10.0
libtpu: 0.0.40
codegen_flags: <defaults>
</compile_context>

<pallas_src>
import functools
import math

import numpy as np
import jax
import jax.numpy as jnp
from jax.experimental import pallas as pl
from jax.experimental.pallas import tpu as pltpu


# ----------------------------- config (small) -------------------------------
BATCH = 2
STATE_DIM = 8
ACTION_DIM = 4
T_DIM = 16          # sinusoidal time-embedding dim (MLP default t_dim=16)
HIDDEN = 32         # hidden width of the noise model (small stand-in for 256)
N_TIMESTEPS = 10    # small n_timesteps for the demo
MAX_ACTION = 1.0
BETA_START, BETA_END = 1e-4, 2e-2   # linear_beta_schedule defaults


# ------------------------- packed-parameter slab layout ----------------------
def _build_slab_layout():
    entries = [
        ("w1t",   (T_DIM, 2 * T_DIM)),
        ("b1t",   (1, 2 * T_DIM)),
        ("w2t",   (2 * T_DIM, T_DIM)),
        ("b2t",   (1, T_DIM)),
        ("wx",    (ACTION_DIM, HIDDEN)),
        ("wt",    (T_DIM, HIDDEN)),
        ("ws",    (STATE_DIM, HIDDEN)),
        ("b1",    (1, HIDDEN)),
        ("w2",    (HIDDEN, HIDDEN)),
        ("b2",    (1, HIDDEN)),
        ("w3",    (HIDDEN, HIDDEN)),
        ("b3",    (1, HIDDEN)),
        ("wf",    (HIDDEN, ACTION_DIM)),
        ("bf",    (1, ACTION_DIM)),
        ("tsin",  (N_TIMESTEPS, T_DIM)),
        ("state", (BATCH, STATE_DIM)),
        ("x0",    (BATCH, ACTION_DIM)),
        ("noise", (N_TIMESTEPS * BATCH, ACTION_DIM)),   # pre-scaled by sigma_t
    ]
    offs, row = {}, 0
    for name, shp in entries:
        offs[name] = (row, shp)
        row += -(-shp[0] // 8) * 8       # keep every entry sublane-(8)-aligned
    return offs, row


_SLAB_OFS, _SLAB_ROWS = _build_slab_layout()
_SLAB_LANES = 128


def pack_slab(tensors):
    """Packs all parameters/activations into one (ROWS, 128) f32 slab (1 DMA)."""
    slab = jnp.zeros((_SLAB_ROWS, _SLAB_LANES), jnp.float32)
    for name, arr in tensors.items():
        r0, shp = _SLAB_OFS[name]
        slab = slab.at[r0:r0 + shp[0], :shp[1]].set(
            jnp.asarray(arr, jnp.float32).reshape(shp))
    return slab


# ----------------------------- in-kernel helpers ------------------------------
def _mish(x):
    # mish(x) = x * tanh(softplus(x)).  With u = exp(x):
    #   tanh(softplus(x)) = (u^2 + 2u) / (u^2 + 2u + 2)
    # 2 EUP ops (exp + approx reciprocal) instead of exp + log1p + tanh.
    # min(x, 20) keeps u^2 finite; for x >= 20 the factor is 1 to f32 precision.
    u = jnp.exp(jnp.minimum(x, 20.0))
    p = u * (u + 2.0)
    return x * p * pl.reciprocal(p + 2.0, approx=True)


# ------------------------------ Pallas kernel --------------------------------
def _diffusion_kernel(slab_ref, out_ref, *, coefs, n_steps):
    def view(name):
        r0, (rows, cols) = _SLAB_OFS[name]
        return slab_ref[r0:r0 + rows, :cols]        # static slice of one VMEM ref

    # ---- hoisted x-independent work (f32; off the serial x-chain) -----------
    t_all = view("tsin")                                               # (T, T_DIM)
    h = _mish(jnp.dot(t_all, view("w1t"), preferred_element_type=jnp.float32)
              + view("b1t"))
    temb = jnp.dot(h, view("w2t"), preferred_element_type=jnp.float32) + view("b2t")
    temb_proj = jnp.dot(temb, view("wt"), preferred_element_type=jnp.float32)   # (T, H)
    state_bias = (jnp.dot(view("state"), view("ws"),
                          preferred_element_type=jnp.float32) + view("b1"))     # (B, H)
    # Pre-combined per-step first-layer bias: only ONE vadd per step remains on
    # the serial chain, and no per-step sublane extract of temb_proj.
    bias_steps = [temb_proj[t:t + 1] + state_bias for t in range(n_steps)]

    # bf16 copies of the loop weights: single-pass MXU matmuls (f32 accumulate).
    wx = view("wx").astype(jnp.bfloat16)
    w2 = view("w2").astype(jnp.bfloat16)
    w3 = view("w3").astype(jnp.bfloat16)
    wf = view("wf").astype(jnp.bfloat16)
    # Biases broadcast to (B, ·) once (hoisted; JAX does not CSE broadcasts).
    b2 = jnp.broadcast_to(view("b2"), (BATCH, HIDDEN))
    b3 = jnp.broadcast_to(view("b3"), (BATCH, HIDDEN))
    bf = jnp.broadcast_to(view("bf"), (BATCH, ACTION_DIM))

    nrow0 = _SLAB_OFS["noise"][0]

    # ---- serial reverse-diffusion chain (static, fully unrolled; T small) ---
    x = view("x0")                                                     # (B, A) f32
    for t in range(n_steps - 1, -1, -1):
        c0, c1, c2, c3 = coefs[t]                 # compile-time Python floats
        # eps = MLP(x, t, state); concat folded into x@Wx + bias_steps[t]
        h1 = _mish(jnp.dot(x.astype(jnp.bfloat16), wx,
                           preferred_element_type=jnp.float32) + bias_steps[t])
        h2 = _mish(jnp.dot(h1.astype(jnp.bfloat16), w2,
                           preferred_element_type=jnp.float32) + b2)
        h3 = _mish(jnp.dot(h2.astype(jnp.bfloat16), w3,
                           preferred_element_type=jnp.float32) + b3)
        eps = jnp.dot(h3.astype(jnp.bfloat16), wf,
                      preferred_element_type=jnp.float32) + bf         # (B, A)

        # p_sample: predict_start_from_noise -> clip -> q_posterior mean + noise.
        # Noise is already pre-scaled by sigma_t (which also encodes the t==0 mask).
        x_recon = jnp.clip(c0 * x - c1 * eps, -MAX_ACTION, MAX_ACTION)
        noise_t = slab_ref[nrow0 + t * BATCH:nrow0 + (t + 1) * BATCH, :ACTION_DIM]
        x = c2 * x_recon + c3 * x + noise_t

    # final clamp of sample(), written exactly once.
    out_ref[...] = jnp.clip(x, -MAX_ACTION, MAX_ACTION)


def diffusion_sample(x_init, state, t_sin, per_step_noise, sched, params):
    """Runs the full reverse diffusion loop in a single grid-less pallas_call."""
    T = per_step_noise.shape[0]
    assert T == N_TIMESTEPS
    (w1t, b1t, w2t, b2t, wx, wt, ws, b1, w2, b2, w3, b3, wf, bf) = params

    # sigma_t (incl. the t==0 mask and exp(0.5*logvar)) folded into the noise.
    sigma = jnp.asarray(sched["sigma"], jnp.float32)
    noise_scaled = (per_step_noise * sigma[:, None, None]).reshape(
        T * BATCH, ACTION_DIM)

    slab = pack_slab({
        "w1t": w1t, "b1t": b1t, "w2t": w2t, "b2t": b2t,
        "wx": wx, "wt": wt, "ws": ws, "b1": b1,
        "w2": w2, "b2": b2, "w3": w3, "b3": b3,
        "wf": wf, "bf": bf, "tsin": t_sin,
        "state": state, "x0": x_init, "noise": noise_scaled,
    })

    coefs = tuple(
        (float(sched["c0"][t]), float(sched["c1"][t]),
         float(sched["c2"][t]), float(sched["c3"][t])) for t in range(T))

    kernel = functools.partial(_diffusion_kernel, coefs=coefs, n_steps=T)
    return pl.pallas_call(
        kernel,
        out_shape=jax.ShapeDtypeStruct((BATCH, ACTION_DIM), jnp.float32),
        in_specs=[pl.BlockSpec(memory_space=pltpu.MemorySpace.VMEM)],
        out_specs=pl.BlockSpec(memory_space=pltpu.MemorySpace.VMEM),
    )(slab)


# ------------------------------ plain-JAX reference --------------------------
def diffusion_sample_ref(x_init, state, t_sin, per_step_noise, sched, params):
    # Independent of the kernel's hoisting / folding / bf16 / rational-mish
    # tricks: pure f32, standard mish, explicit t==0 mask and exp(0.5*logvar).
    (w1t, b1t, w2t, b2t, wx, wt, ws, b1, w2, b2, w3, b3, wf, bf) = params
    T = per_step_noise.shape[0]

    def mish(v):
        sp = jnp.maximum(v, 0.0) + jnp.log1p(jnp.exp(-jnp.abs(v)))
        return v * jnp.tanh(sp)

    x = x_init
    for t in reversed(range(T)):
        temb = t_sin[t:t + 1]
        hh = mish(temb @ w1t + b1t)
        temb = hh @ w2t + b2t
        h1 = mish(x @ wx + temb @ wt + state @ ws + b1)
        h2 = mish(h1 @ w2 + b2)
        h3 = mish(h2 @ w3 + b3)
        eps = h3 @ wf + bf
        x_recon = jnp.clip(float(sched["c0"][t]) * x - float(sched["c1"][t]) * eps,
                           -MAX_ACTION, MAX_ACTION)
        mean = float(sched["c2"][t]) * x_recon + float(sched["c3"][t]) * x
        mask = 0.0 if t == 0 else 1.0
        x = mean + mask * jnp.exp(0.5 * float(sched["logvar"][t])) * per_step_noise[t]
    return jnp.clip(x, -MAX_ACTION, MAX_ACTION)


# ------------------------------ setup (glue) ----------------------------------
def make_schedule(T):
    betas = np.linspace(BETA_START, BETA_END, T).astype(np.float32)
    alphas = (1.0 - betas).astype(np.float32)
    ac = np.cumprod(alphas).astype(np.float32)
    ac_prev = np.concatenate([np.ones((1,), np.float32), ac[:-1]])
    sqrt_recip_ac = np.sqrt(1.0 / ac).astype(np.float32)
    sqrt_recipm1_ac = np.sqrt(1.0 / ac - 1.0).astype(np.float32)
    post_var = (betas * (1.0 - ac_prev) / (1.0 - ac)).astype(np.float32)
    post_logvar = np.log(np.clip(post_var, 1e-20, None)).astype(np.float32)
    pm_c1 = (betas * np.sqrt(ac_prev) / (1.0 - ac)).astype(np.float32)
    pm_c2 = ((1.0 - ac_prev) * np.sqrt(alphas) / (1.0 - ac)).astype(np.float32)
    sigma = np.where(np.arange(T) == 0, 0.0,
                     np.exp(0.5 * post_logvar)).astype(np.float32)
    return dict(c0=sqrt_recip_ac, c1=sqrt_recipm1_ac, c2=pm_c1, c3=pm_c2,
                sigma=sigma, logvar=post_logvar)


def make_time_embeddings(T, dim):
    half = dim // 2
    scale = math.log(10000.0) / (half - 1)
    freqs = jnp.exp(jnp.arange(half, dtype=jnp.float32) * -scale)
    ts = jnp.arange(T, dtype=jnp.float32)[:, None] * freqs[None, :]
    emb = jnp.concatenate([jnp.sin(ts), jnp.cos(ts)], axis=-1)
    return emb.astype(jnp.float32)                         # (T, dim)


def init_linear(key, fan_in, fan_out):
    k1, k2 = jax.random.split(key)
    bound = 1.0 / math.sqrt(fan_in)
    w = jax.random.uniform(k1, (fan_in, fan_out), jnp.float32, -bound, bound)
    b = jax.random.uniform(k2, (1, fan_out), jnp.float32, -bound, bound)
    return w, b


def init_params(key):
    keys = jax.random.split(key, 6)
    w1t, b1t = init_linear(keys[0], T_DIM, 2 * T_DIM)
    w2t, b2t = init_linear(keys[1], 2 * T_DIM, T_DIM)
    in_dim = ACTION_DIM + T_DIM + STATE_DIM
    w1, b1 = init_linear(keys[2], in_dim, HIDDEN)
    wx, wt, ws = (w1[:ACTION_DIM], w1[ACTION_DIM:ACTION_DIM + T_DIM],
                  w1[ACTION_DIM + T_DIM:])
    w2, b2 = init_linear(keys[3], HIDDEN, HIDDEN)
    w3, b3 = init_linear(keys[4], HIDDEN, HIDDEN)
    wf, bf = init_linear(keys[5], HIDDEN, ACTION_DIM)
    return (w1t, b1t, w2t, b2t, wx, wt, ws, b1, w2, b2, w3, b3, wf, bf)


if __name__ == "__main__":
    key = jax.random.PRNGKey(0)
    k_params, k_state, k_x, k_noise = jax.random.split(key, 4)

    params = init_params(k_params)
    state = jax.random.normal(k_state, (BATCH, STATE_DIM), jnp.float32)
    x_init = jax.random.normal(k_x, (BATCH, ACTION_DIM), jnp.float32)
    per_step_noise = jax.random.normal(
        k_noise, (N_TIMESTEPS, BATCH, ACTION_DIM), jnp.float32)

    sched = make_schedule(N_TIMESTEPS)
    t_sin = make_time_embeddings(N_TIMESTEPS, T_DIM)

    action = diffusion_sample(x_init, state, t_sin, per_step_noise, sched, params)
    action = jax.block_until_ready(action)

    ref = diffusion_sample_ref(x_init, state, t_sin, per_step_noise, sched, params)
    assert action.shape == (BATCH, ACTION_DIM)
    # Tolerance sized for bf16 MXU inputs + approx-reciprocal mish in the
    # kernel vs. the pure-f32 reference (output is bounded to [-1, 1]).
    assert jnp.allclose(action, ref, rtol=1e-2, atol=1e-2), (action, ref)

    print("KERNEL_OK")
</pallas_src>

<mosaic_0001>
module attributes {stable_mosaic.version = 11 : i64} {
  func.func @_diffusion_kernel(%arg0: memref<280x128xf32, #tpu.memory_space<vmem>>, %arg1: memref<2x4xf32, #tpu.memory_space<vmem>>) attributes {dimension_semantics = [], scalar_prefetch = 0 : i64, scratch_operands = 0 : i64, tpu.core_type = #tpu.core_type<tc>} {
    %c224 = arith.constant 224 : index
    %c0 = arith.constant 0 : index
    %0 = vector.load %arg0[%c224, %c0] : memref<280x128xf32, #tpu.memory_space<vmem>>, vector<10x16xf32>
    %c0_0 = arith.constant 0 : index
    %c0_1 = arith.constant 0 : index
    %1 = vector.load %arg0[%c0_0, %c0_1] : memref<280x128xf32, #tpu.memory_space<vmem>>, vector<16x32xf32>
    %cst = arith.constant dense<0.000000e+00> : vector<10x32xf32>
    %2 = tpu.matmul %0, %1, %cst {dimension_numbers = #tpu.dot_dimension_numbers<[1], [0], [0], [1], [0, 0, 1, 1], [], []>} : vector<10x16xf32>, vector<16x32xf32>, vector<10x32xf32> -> vector<10x32xf32>
    %c16 = arith.constant 16 : index
    %c0_2 = arith.constant 0 : index
    %3 = vector.load %arg0[%c16, %c0_2] : memref<280x128xf32, #tpu.memory_space<vmem>>, vector<1x32xf32>
    %4 = vector.broadcast %3 : vector<1x32xf32> to vector<10x32xf32>
    %5 = arith.addf %2, %4 : vector<10x32xf32>
    %cst_3 = arith.constant 2.000000e+01 : f32
    %6 = vector.broadcast %cst_3 : f32 to vector<10x32xf32>
    %7 = arith.minimumf %5, %6 : vector<10x32xf32>
    %8 = math.exp %7 : vector<10x32xf32>
    %cst_4 = arith.constant 2.000000e+00 : f32
    %9 = vector.broadcast %cst_4 : f32 to vector<10x32xf32>
    %10 = arith.addf %8, %9 : vector<10x32xf32>
    %11 = arith.mulf %8, %10 : vector<10x32xf32>
    %12 = arith.mulf %5, %11 : vector<10x32xf32>
    %cst_5 = arith.constant 2.000000e+00 : f32
    %13 = vector.broadcast %cst_5 : f32 to vector<10x32xf32>
    %14 = arith.addf %11, %13 : vector<10x32xf32>
    %15 = tpu.reciprocal %14 {approx = true} : vector<10x32xf32> -> vector<10x32xf32>
    %16 = arith.mulf %12, %15 : vector<10x32xf32>
    %c24 = arith.constant 24 : index
    %c0_6 = arith.constant 0 : index
    %17 = vector.load %arg0[%c24, %c0_6] : memref<280x128xf32, #tpu.memory_space<vmem>>, vector<32x16xf32>
    %cst_7 = arith.constant dense<0.000000e+00> : vector<10x16xf32>
    %18 = tpu.matmul %16, %17, %cst_7 {dimension_numbers = #tpu.dot_dimension_numbers<[1], [0], [0], [1], [0, 0, 1, 1], [], []>} : vector<10x32xf32>, vector<32x16xf32>, vector<10x16xf32> -> vector<10x16xf32>
    %c56 = arith.constant 56 : index
    %c0_8 = arith.constant 0 : index
    %19 = vector.load %arg0[%c56, %c0_8] : memref<280x128xf32, #tpu.memory_space<vmem>>, vector<1x16xf32>
    %20 = vector.broadcast %19 : vector<1x16xf32> to vector<10x16xf32>
    %21 = arith.addf %18, %20 : vector<10x16xf32>
    %c72 = arith.constant 72 : index
    %c0_9 = arith.constant 0 : index
    %22 = vector.load %arg0[%c72, %c0_9] : memref<280x128xf32, #tpu.memory_space<vmem>>, vector<16x32xf32>
    %cst_10 = arith.constant dense<0.000000e+00> : vector<10x32xf32>
    %23 = tpu.matmul %21, %22, %cst_10 {dimension_numbers = #tpu.dot_dimension_numbers<[1], [0], [0], [1], [0, 0, 1, 1], [], []>} : vector<10x16xf32>, vector<16x32xf32>, vector<10x32xf32> -> vector<10x32xf32>
    %c240 = arith.constant 240 : index
    %c0_11 = arith.constant 0 : index
    %24 = vector.load %arg0[%c240, %c0_11] : memref<280x128xf32, #tpu.memory_space<vmem>>, vector<2x8xf32>
    %c88 = arith.constant 88 : index
    %c0_12 = arith.constant 0 : index
    %25 = vector.load %arg0[%c88, %c0_12] : memref<280x128xf32, #tpu.memory_space<vmem>>, vector<8x32xf32>
    %cst_13 = arith.constant dense<0.000000e+00> : vector<2x32xf32>
    %26 = tpu.matmul %24, %25, %cst_13 {dimension_numbers = #tpu.dot_dimension_numbers<[1], [0], [0], [1], [0, 0, 1, 1], [], []>} : vector<2x8xf32>, vector<8x32xf32>, vector<2x32xf32> -> vector<2x32xf32>
    %c96 = arith.constant 96 : index
    %c0_14 = arith.constant 0 : index
    %27 = vector.load %arg0[%c96, %c0_14] : memref<280x128xf32, #tpu.memory_space<vmem>>, vector<1x32xf32>
    %28 = vector.broadcast %27 : vector<1x32xf32> to vector<2x32xf32>
    %29 = arith.addf %26, %28 : vector<2x32xf32>
    %30 = vector.extract_strided_slice %23 {offsets = [0, 0], sizes = [1, 32], strides = [1, 1]} : vector<10x32xf32> to vector<1x32xf32>
    %31 = vector.broadcast %30 : vector<1x32xf32> to vector<2x32xf32>
    %32 = arith.addf %31, %29 : vector<2x32xf32>
    %33 = vector.extract_strided_slice %23 {offsets = [1, 0], sizes = [1, 32], strides = [1, 1]} : vector<10x32xf32> to vector<1x32xf32>
    %34 = vector.broadcast %33 : vector<1x32xf32> to vector<2x32xf32>
    %35 = arith.addf %34, %29 : vector<2x32xf32>
    %36 = vector.extract_strided_slice %23 {offsets = [2, 0], sizes = [1, 32], strides = [1, 1]} : vector<10x32xf32> to vector<1x32xf32>
    %37 = vector.broadcast %36 : vector<1x32xf32> to vector<2x32xf32>
    %38 = arith.addf %37, %29 : vector<2x32xf32>
    %39 = vector.extract_strided_slice %23 {offsets = [3, 0], sizes = [1, 32], strides = [1, 1]} : vector<10x32xf32> to vector<1x32xf32>
    %40 = vector.broadcast %39 : vector<1x32xf32> to vector<2x32xf32>
    %41 = arith.addf %40, %29 : vector<2x32xf32>
    %42 = vector.extract_strided_slice %23 {offsets = [4, 0], sizes = [1, 32], strides = [1, 1]} : vector<10x32xf32> to vector<1x32xf32>
    %43 = vector.broadcast %42 : vector<1x32xf32> to vector<2x32xf32>
    %44 = arith.addf %43, %29 : vector<2x32xf32>
    %45 = vector.extract_strided_slice %23 {offsets = [5, 0], sizes = [1, 32], strides = [1, 1]} : vector<10x32xf32> to vector<1x32xf32>
    %46 = vector.broadcast %45 : vector<1x32xf32> to vector<2x32xf32>
    %47 = arith.addf %46, %29 : vector<2x32xf32>
    %48 = vector.extract_strided_slice %23 {offsets = [6, 0], sizes = [1, 32], strides = [1, 1]} : vector<10x32xf32> to vector<1x32xf32>
    %49 = vector.broadcast %48 : vector<1x32xf32> to vector<2x32xf32>
    %50 = arith.addf %49, %29 : vector<2x32xf32>
    %51 = vector.extract_strided_slice %23 {offsets = [7, 0], sizes = [1, 32], strides = [1, 1]} : vector<10x32xf32> to vector<1x32xf32>
    %52 = vector.broadcast %51 : vector<1x32xf32> to vector<2x32xf32>
    %53 = arith.addf %52, %29 : vector<2x32xf32>
    %54 = vector.extract_strided_slice %23 {offsets = [8, 0], sizes = [1, 32], strides = [1, 1]} : vector<10x32xf32> to vector<1x32xf32>
    %55 = vector.broadcast %54 : vector<1x32xf32> to vector<2x32xf32>
    %56 = arith.addf %55, %29 : vector<2x32xf32>
    %57 = vector.extract_strided_slice %23 {offsets = [9, 0], sizes = [1, 32], strides = [1, 1]} : vector<10x32xf32> to vector<1x32xf32>
    %58 = vector.broadcast %57 : vector<1x32xf32> to vector<2x32xf32>
    %59 = arith.addf %58, %29 : vector<2x32xf32>
    %c64 = arith.constant 64 : index
    %c0_15 = arith.constant 0 : index
    %60 = vector.load %arg0[%c64, %c0_15] : memref<280x128xf32, #tpu.memory_space<vmem>>, vector<4x32xf32>
    %61 = arith.truncf %60 : vector<4x32xf32> to vector<4x32xbf16>
    %c104 = arith.constant 104 : index
    %c0_16 = arith.constant 0 : index
    %62 = vector.load %arg0[%c104, %c0_16] : memref<280x128xf32, #tpu.memory_space<vmem>>, vector<32x32xf32>
    %63 = arith.truncf %62 : vector<32x32xf32> to vector<32x32xbf16>
    %c144 = arith.constant 144 : index
    %c0_17 = arith.constant 0 : index
    %64 = vector.load %arg0[%c144, %c0_17] : memref<280x128xf32, #tpu.memory_space<vmem>>, vector<32x32xf32>
    %65 = arith.truncf %64 : vector<32x32xf32> to vector<32x32xbf16>
    %c184 = arith.constant 184 : index
    %c0_18 = arith.constant 0 : index
    %66 = vector.load %arg0[%c184, %c0_18] : memref<280x128xf32, #tpu.memory_space<vmem>>, vector<32x4xf32>
    %67 = arith.truncf %66 : vector<32x4xf32> to vector<32x4xbf16>
    %c136 = arith.constant 136 : index
    %c0_19 = arith.constant 0 : index
    %68 = vector.load %arg0[%c136, %c0_19] : memref<280x128xf32, #tpu.memory_space<vmem>>, vector<1x32xf32>
    %69 = vector.shape_cast %68 : vector<1x32xf32> to vector<1x32xf32>
    %70 = vector.broadcast %69 : vector<1x32xf32> to vector<2x32xf32>
    %c176 = arith.constant 176 : index
    %c0_20 = arith.constant 0 : index
    %71 = vector.load %arg0[%c176, %c0_20] : memref<280x128xf32, #tpu.memory_space<vmem>>, vector<1x32xf32>
    %72 = vector.shape_cast %71 : vector<1x32xf32> to vector<1x32xf32>
    %73 = vector.broadcast %72 : vector<1x32xf32> to vector<2x32xf32>
    %c216 = arith.constant 216 : index
    %c0_21 = arith.constant 0 : index
    %74 = vector.load %arg0[%c216, %c0_21] : memref<280x128xf32, #tpu.memory_space<vmem>>, vector<1x4xf32>
    %75 = vector.shape_cast %74 : vector<1x4xf32> to vector<1x4xf32>
    %76 = vector.broadcast %75 : vector<1x4xf32> to vector<2x4xf32>
    %c248 = arith.constant 248 : index
    %c0_22 = arith.constant 0 : index
    %77 = vector.load %arg0[%c248, %c0_22] : memref<280x128xf32, #tpu.memory_space<vmem>>, vector<2x4xf32>
    %78 = arith.truncf %77 : vector<2x4xf32> to vector<2x4xbf16>
    %cst_23 = arith.constant dense<0.000000e+00> : vector<2x32xf32>
    %79 = tpu.matmul %78, %61, %cst_23 {dimension_numbers = #tpu.dot_dimension_numbers<[1], [0], [0], [1], [0, 0, 1, 1], [], []>} : vector<2x4xbf16>, vector<4x32xbf16>, vector<2x32xf32> -> vector<2x32xf32>
    %80 = arith.addf %79, %59 : vector<2x32xf32>
    %cst_24 = arith.constant 2.000000e+01 : f32
    %81 = vector.broadcast %cst_24 : f32 to vector<2x32xf32>
    %82 = arith.minimumf %80, %81 : vector<2x32xf32>
    %83 = math.exp %82 : vector<2x32xf32>
    %cst_25 = arith.constant 2.000000e+00 : f32
    %84 = vector.broadcast %cst_25 : f32 to vector<2x32xf32>
    %85 = arith.addf %83, %84 : vector<2x32xf32>
    %86 = arith.mulf %83, %85 : vector<2x32xf32>
    %87 = arith.mulf %80, %86 : vector<2x32xf32>
    %cst_26 = arith.constant 2.000000e+00 : f32
    %88 = vector.broadcast %cst_26 : f32 to vector<2x32xf32>
    %89 = arith.addf %86, %88 : vector<2x32xf32>
    %90 = tpu.reciprocal %89 {approx = true} : vector<2x32xf32> -> vector<2x32xf32>
    %91 = arith.mulf %87, %90 : vector<2x32xf32>
    %92 = arith.truncf %91 : vector<2x32xf32> to vector<2x32xbf16>
    %cst_27 = arith.constant dense<0.000000e+00> : vector<2x32xf32>
    %93 = tpu.matmul %92, %63, %cst_27 {dimension_numbers = #tpu.dot_dimension_numbers<[1], [0], [0], [1], [0, 0, 1, 1], [], []>} : vector<2x32xbf16>, vector<32x32xbf16>, vector<2x32xf32> -> vector<2x32xf32>
    %94 = arith.addf %93, %70 : vector<2x32xf32>
    %cst_28 = arith.constant 2.000000e+01 : f32
    %95 = vector.broadcast %cst_28 : f32 to vector<2x32xf32>
    %96 = arith.minimumf %94, %95 : vector<2x32xf32>
    %97 = math.exp %96 : vector<2x32xf32>
    %cst_29 = arith.constant 2.000000e+00 : f32
    %98 = vector.broadcast %cst_29 : f32 to vector<2x32xf32>
    %99 = arith.addf %97, %98 : vector<2x32xf32>
    %100 = arith.mulf %97, %99 : vector<2x32xf32>
    %101 = arith.mulf %94, %100 : vector<2x32xf32>
    %cst_30 = arith.constant 2.000000e+00 : f32
    %102 = vector.broadcast %cst_30 : f32 to vector<2x32xf32>
    %103 = arith.addf %100, %102 : vector<2x32xf32>
    %104 = tpu.reciprocal %103 {approx = true} : vector<2x32xf32> -> vector<2x32xf32>
    %105 = arith.mulf %101, %104 : vector<2x32xf32>
    %106 = arith.truncf %105 : vector<2x32xf32> to vector<2x32xbf16>
    %cst_31 = arith.constant dense<0.000000e+00> : vector<2x32xf32>
    %107 = tpu.matmul %106, %65, %cst_31 {dimension_numbers = #tpu.dot_dimension_numbers<[1], [0], [0], [1], [0, 0, 1, 1], [], []>} : vector<2x32xbf16>, vector<32x32xbf16>, vector<2x32xf32> -> vector<2x32xf32>
    %108 = arith.addf %107, %73 : vector<2x32xf32>
    %cst_32 = arith.constant 2.000000e+01 : f32
    %109 = vector.broadcast %cst_32 : f32 to vector<2x32xf32>
    %110 = arith.minimumf %108, %109 : vector<2x32xf32>
    %111 = math.exp %110 : vector<2x32xf32>
    %cst_33 = arith.constant 2.000000e+00 : f32
    %112 = vector.broadcast %cst_33 : f32 to vector<2x32xf32>
    %113 = arith.addf %111, %112 : vector<2x32xf32>
    %114 = arith.mulf %111, %113 : vector<2x32xf32>
    %115 = arith.mulf %108, %114 : vector<2x32xf32>
    %cst_34 = arith.constant 2.000000e+00 : f32
    %116 = vector.broadcast %cst_34 : f32 to vector<2x32xf32>
    %117 = arith.addf %114, %116 : vector<2x32xf32>
    %118 = tpu.reciprocal %117 {approx = true} : vector<2x32xf32> -> vector<2x32xf32>
    %119 = arith.mulf %115, %118 : vector<2x32xf32>
    %120 = arith.truncf %119 : vector<2x32xf32> to vector<2x32xbf16>
    %cst_35 = arith.constant dense<0.000000e+00> : vector<2x4xf32>
    %121 = tpu.matmul %120, %67, %cst_35 {dimension_numbers = #tpu.dot_dimension_numbers<[1], [0], [0], [1], [0, 0, 1, 1], [], []>} : vector<2x32xbf16>, vector<32x4xbf16>, vector<2x4xf32> -> vector<2x4xf32>
    %122 = arith.addf %121, %76 : vector<2x4xf32>
    %cst_36 = arith.constant 1.05190957 : f32
    %123 = vector.broadcast %cst_36 : f32 to vector<2x4xf32>
    %124 = arith.mulf %123, %77 : vector<2x4xf32>
    %cst_37 = arith.constant 0.326364249 : f32
    %125 = vector.broadcast %cst_37 : f32 to vector<2x4xf32>
    %126 = arith.mulf %125, %122 : vector<2x4xf32>
    %127 = arith.subf %124, %126 : vector<2x4xf32>
    %cst_38 = arith.constant -1.000000e+00 : f32
    %cst_39 = arith.constant 1.000000e+00 : f32
    %128 = vector.broadcast %cst_38 : f32 to vector<2x4xf32>
    %129 = arith.maximumf %128, %127 : vector<2x4xf32>
    %130 = vector.broadcast %cst_39 : f32 to vector<2x4xf32>
    %131 = arith.minimumf %130, %129 : vector<2x4xf32>
    %c274 = arith.constant 274 : index
    %c0_40 = arith.constant 0 : index
    %132 = vector.load %arg0[%c274, %c0_40] : memref<280x128xf32, #tpu.memory_space<vmem>>, vector<2x4xf32>
    %cst_41 = arith.constant 0.19952175 : f32
    %133 = vector.broadcast %cst_41 : f32 to vector<2x4xf32>
    %134 = arith.mulf %133, %131 : vector<2x4xf32>
    %cst_42 = arith.constant 0.800273954 : f32
    %135 = vector.broadcast %cst_42 : f32 to vector<2x4xf32>
    %136 = arith.mulf %135, %77 : vector<2x4xf32>
    %137 = arith.addf %134, %136 : vector<2x4xf32>
    %138 = arith.addf %137, %132 : vector<2x4xf32>
    %139 = arith.truncf %138 : vector<2x4xf32> to vector<2x4xbf16>
    %cst_43 = arith.constant dense<0.000000e+00> : vector<2x32xf32>
    %140 = tpu.matmul %139, %61, %cst_43 {dimension_numbers = #tpu.dot_dimension_numbers<[1], [0], [0], [1], [0, 0, 1, 1], [], []>} : vector<2x4xbf16>, vector<4x32xbf16>, vector<2x32xf32> -> vector<2x32xf32>
    %141 = arith.addf %140, %56 : vector<2x32xf32>
    %cst_44 = arith.constant 2.000000e+01 : f32
    %142 = vector.broadcast %cst_44 : f32 to vector<2x32xf32>
    %143 = arith.minimumf %141, %142 : vector<2x32xf32>
    %144 = math.exp %143 : vector<2x32xf32>
    %cst_45 = arith.constant 2.000000e+00 : f32
    %145 = vector.broadcast %cst_45 : f32 to vector<2x32xf32>
    %146 = arith.addf %144, %145 : vector<2x32xf32>
    %147 = arith.mulf %144, %146 : vector<2x32xf32>
    %148 = arith.mulf %141, %147 : vector<2x32xf32>
    %cst_46 = arith.constant 2.000000e+00 : f32
    %149 = vector.broadcast %cst_46 : f32 to vector<2x32xf32>
    %150 = arith.addf %147, %149 : vector<2x32xf32>
    %151 = tpu.reciprocal %150 {approx = true} : vector<2x32xf32> -> vector<2x32xf32>
    %152 = arith.mulf %148, %151 : vector<2x32xf32>
    %153 = arith.truncf %152 : vector<2x32xf32> to vector<2x32xbf16>
    %cst_47 = arith.constant dense<0.000000e+00> : vector<2x32xf32>
    %154 = tpu.matmul %153, %63, %cst_47 {dimension_numbers = #tpu.dot_dimension_numbers<[1], [0], [0], [1], [0, 0, 1, 1], [], []>} : vector<2x32xbf16>, vector<32x32xbf16>, vector<2x32xf32> -> vector<2x32xf32>
    %155 = arith.addf %154, %70 : vector<2x32xf32>
    %cst_48 = arith.constant 2.000000e+01 : f32
    %156 = vector.broadcast %cst_48 : f32 to vector<2x32xf32>
    %157 = arith.minimumf %155, %156 : vector<2x32xf32>
    %158 = math.exp %157 : vector<2x32xf32>
    %cst_49 = arith.constant 2.000000e+00 : f32
    %159 = vector.broadcast %cst_49 : f32 to vector<2x32xf32>
    %160 = arith.addf %158, %159 : vector<2x32xf32>
    %161 = arith.mulf %158, %160 : vector<2x32xf32>
    %162 = arith.mulf %155, %161 : vector<2x32xf32>
    %cst_50 = arith.constant 2.000000e+00 : f32
    %163 = vector.broadcast %cst_50 : f32 to vector<2x32xf32>
    %164 = arith.addf %161, %163 : vector<2x32xf32>
    %165 = tpu.reciprocal %164 {approx = true} : vector<2x32xf32> -> vector<2x32xf32>
    %166 = arith.mulf %162, %165 : vector<2x32xf32>
    %167 = arith.truncf %166 : vector<2x32xf32> to vector<2x32xbf16>
    %cst_51 = arith.constant dense<0.000000e+00> : vector<2x32xf32>
    %168 = tpu.matmul %167, %65, %cst_51 {dimension_numbers = #tpu.dot_dimension_numbers<[1], [0], [0], [1], [0, 0, 1, 1], [], []>} : vector<2x32xbf16>, vector<32x32xbf16>, vector<2x32xf32> -> vector<2x32xf32>
    %169 = arith.addf %168, %73 : vector<2x32xf32>
    %cst_52 = arith.constant 2.000000e+01 : f32
    %170 = vector.broadcast %cst_52 : f32 to vector<2x32xf32>
    %171 = arith.minimumf %169, %170 : vector<2x32xf32>
    %172 = math.exp %171 : vector<2x32xf32>
    %cst_53 = arith.constant 2.000000e+00 : f32
    %173 = vector.broadcast %cst_53 : f32 to vector<2x32xf32>
    %174 = arith.addf %172, %173 : vector<2x32xf32>
    %175 = arith.mulf %172, %174 : vector<2x32xf32>
    %176 = arith.mulf %169, %175 : vector<2x32xf32>
    %cst_54 = arith.constant 2.000000e+00 : f32
    %177 = vector.broadcast %cst_54 : f32 to vector<2x32xf32>
    %178 = arith.addf %175, %177 : vector<2x32xf32>
    %179 = tpu.reciprocal %178 {approx = true} : vector<2x32xf32> -> vector<2x32xf32>
    %180 = arith.mulf %176, %179 : vector<2x32xf32>
    %181 = arith.truncf %180 : vector<2x32xf32> to vector<2x32xbf16>
    %cst_55 = arith.constant dense<0.000000e+00> : vector<2x4xf32>
    %182 = tpu.matmul %181, %67, %cst_55 {dimension_numbers = #tpu.dot_dimension_numbers<[1], [0], [0], [1], [0, 0, 1, 1], [], []>} : vector<2x32xbf16>, vector<32x4xbf16>, vector<2x4xf32> -> vector<2x4xf32>
    %183 = arith.addf %182, %76 : vector<2x4xf32>
    %cst_56 = arith.constant 1.04133725 : f32
    %184 = vector.broadcast %cst_56 : f32 to vector<2x4xf32>
    %185 = arith.mulf %184, %138 : vector<2x4xf32>
    %cst_57 = arith.constant 0.290488154 : f32
    %186 = vector.broadcast %cst_57 : f32 to vector<2x4xf32>
    %187 = arith.mulf %186, %183 : vector<2x4xf32>
    %188 = arith.subf %185, %187 : vector<2x4xf32>
    %cst_58 = arith.constant -1.000000e+00 : f32
    %cst_59 = arith.constant 1.000000e+00 : f32
    %189 = vector.broadcast %cst_58 : f32 to vector<2x4xf32>
    %190 = arith.maximumf %189, %188 : vector<2x4xf32>
    %191 = vector.broadcast %cst_59 : f32 to vector<2x4xf32>
    %192 = arith.minimumf %191, %190 : vector<2x4xf32>
    %c272 = arith.constant 272 : index
    %c0_60 = arith.constant 0 : index
    %193 = vector.load %arg0[%c272, %c0_60] : memref<280x128xf32, #tpu.memory_space<vmem>>, vector<2x4xf32>
    %cst_61 = arith.constant 0.22150372 : f32
    %194 = vector.broadcast %cst_61 : f32 to vector<2x4xf32>
    %195 = arith.mulf %194, %192 : vector<2x4xf32>
    %cst_62 = arith.constant 7.783550e-01 : f32
    %196 = vector.broadcast %cst_62 : f32 to vector<2x4xf32>
    %197 = arith.mulf %196, %138 : vector<2x4xf32>
    %198 = arith.addf %195, %197 : vector<2x4xf32>
    %199 = arith.addf %198, %193 : vector<2x4xf32>
    %200 = arith.truncf %199 : vector<2x4xf32> to vector<2x4xbf16>
    %cst_63 = arith.constant dense<0.000000e+00> : vector<2x32xf32>
    %201 = tpu.matmul %200, %61, %cst_63 {dimension_numbers = #tpu.dot_dimension_numbers<[1], [0], [0], [1], [0, 0, 1, 1], [], []>} : vector<2x4xbf16>, vector<4x32xbf16>, vector<2x32xf32> -> vector<2x32xf32>
    %202 = arith.addf %201, %53 : vector<2x32xf32>
    %cst_64 = arith.constant 2.000000e+01 : f32
    %203 = vector.broadcast %cst_64 : f32 to vector<2x32xf32>
    %204 = arith.minimumf %202, %203 : vector<2x32xf32>
    %205 = math.exp %204 : vector<2x32xf32>
    %cst_65 = arith.constant 2.000000e+00 : f32
    %206 = vector.broadcast %cst_65 : f32 to vector<2x32xf32>
    %207 = arith.addf %205, %206 : vector<2x32xf32>
    %208 = arith.mulf %205, %207 : vector<2x32xf32>
    %209 = arith.mulf %202, %208 : vector<2x32xf32>
    %cst_66 = arith.constant 2.000000e+00 : f32
    %210 = vector.broadcast %cst_66 : f32 to vector<2x32xf32>
    %211 = arith.addf %208, %210 : vector<2x32xf32>
    %212 = tpu.reciprocal %211 {approx = true} : vector<2x32xf32> -> vector<2x32xf32>
    %213 = arith.mulf %209, %212 : vector<2x32xf32>
    %214 = arith.truncf %213 : vector<2x32xf32> to vector<2x32xbf16>
    %cst_67 = arith.constant dense<0.000000e+00> : vector<2x32xf32>
    %215 = tpu.matmul %214, %63, %cst_67 {dimension_numbers = #tpu.dot_dimension_numbers<[1], [0], [0], [1], [0, 0, 1, 1], [], []>} : vector<2x32xbf16>, vector<32x32xbf16>, vector<2x32xf32> -> vector<2x32xf32>
    %216 = arith.addf %215, %70 : vector<2x32xf32>
    %cst_68 = arith.constant 2.000000e+01 : f32
    %217 = vector.broadcast %cst_68 : f32 to vector<2x32xf32>
    %218 = arith.minimumf %216, %217 : vector<2x32xf32>
    %219 = math.exp %218 : vector<2x32xf32>
    %cst_69 = arith.constant 2.000000e+00 : f32
    %220 = vector.broadcast %cst_69 : f32 to vector<2x32xf32>
    %221 = arith.addf %219, %220 : vector<2x32xf32>
    %222 = arith.mulf %219, %221 : vector<2x32xf32>
    %223 = arith.mulf %216, %222 : vector<2x32xf32>
    %cst_70 = arith.constant 2.000000e+00 : f32
    %224 = vector.broadcast %cst_70 : f32 to vector<2x32xf32>
    %225 = arith.addf %222, %224 : vector<2x32xf32>
    %226 = tpu.reciprocal %225 {approx = true} : vector<2x32xf32> -> vector<2x32xf32>
    %227 = arith.mulf %223, %226 : vector<2x32xf32>
    %228 = arith.truncf %227 : vector<2x32xf32> to vector<2x32xbf16>
    %cst_71 = arith.constant dense<0.000000e+00> : vector<2x32xf32>
    %229 = tpu.matmul %228, %65, %cst_71 {dimension_numbers = #tpu.dot_dimension_numbers<[1], [0], [0], [1], [0, 0, 1, 1], [], []>} : vector<2x32xbf16>, vector<32x32xbf16>, vector<2x32xf32> -> vector<2x32xf32>
    %230 = arith.addf %229, %73 : vector<2x32xf32>
    %cst_72 = arith.constant 2.000000e+01 : f32
    %231 = vector.broadcast %cst_72 : f32 to vector<2x32xf32>
    %232 = arith.minimumf %230, %231 : vector<2x32xf32>
    %233 = math.exp %232 : vector<2x32xf32>
    %cst_73 = arith.constant 2.000000e+00 : f32
    %234 = vector.broadcast %cst_73 : f32 to vector<2x32xf32>
    %235 = arith.addf %233, %234 : vector<2x32xf32>
    %236 = arith.mulf %233, %235 : vector<2x32xf32>
    %237 = arith.mulf %230, %236 : vector<2x32xf32>
    %cst_74 = arith.constant 2.000000e+00 : f32
    %238 = vector.broadcast %cst_74 : f32 to vector<2x32xf32>
    %239 = arith.addf %236, %238 : vector<2x32xf32>
    %240 = tpu.reciprocal %239 {approx = true} : vector<2x32xf32> -> vector<2x32xf32>
    %241 = arith.mulf %237, %240 : vector<2x32xf32>
    %242 = arith.truncf %241 : vector<2x32xf32> to vector<2x32xbf16>
    %cst_75 = arith.constant dense<0.000000e+00> : vector<2x4xf32>
    %243 = tpu.matmul %242, %67, %cst_75 {dimension_numbers = #tpu.dot_dimension_numbers<[1], [0], [0], [1], [0, 0, 1, 1], [], []>} : vector<2x32xbf16>, vector<32x4xbf16>, vector<2x4xf32> -> vector<2x4xf32>
    %244 = arith.addf %243, %76 : vector<2x4xf32>
    %cst_76 = arith.constant 1.03203368 : f32
    %245 = vector.broadcast %cst_76 : f32 to vector<2x4xf32>
    %246 = arith.mulf %245, %199 : vector<2x4xf32>
    %cst_77 = arith.constant 0.255134076 : f32
    %247 = vector.broadcast %cst_77 : f32 to vector<2x4xf32>
    %248 = arith.mulf %247, %244 : vector<2x4xf32>
    %249 = arith.subf %246, %248 : vector<2x4xf32>
    %cst_78 = arith.constant -1.000000e+00 : f32
    %cst_79 = arith.constant 1.000000e+00 : f32
    %250 = vector.broadcast %cst_78 : f32 to vector<2x4xf32>
    %251 = arith.maximumf %250, %249 : vector<2x4xf32>
    %252 = vector.broadcast %cst_79 : f32 to vector<2x4xf32>
    %253 = arith.minimumf %252, %251 : vector<2x4xf32>
    %c270 = arith.constant 270 : index
    %c0_80 = arith.constant 0 : index
    %254 = vector.load %arg0[%c270, %c0_80] : memref<280x128xf32, #tpu.memory_space<vmem>>, vector<2x4xf32>
    %cst_81 = arith.constant 0.248926818 : f32
    %255 = vector.broadcast %cst_81 : f32 to vector<2x4xf32>
    %256 = arith.mulf %255, %253 : vector<2x4xf32>
    %cst_82 = arith.constant 0.750980317 : f32
    %257 = vector.broadcast %cst_82 : f32 to vector<2x4xf32>
    %258 = arith.mulf %257, %199 : vector<2x4xf32>
    %259 = arith.addf %256, %258 : vector<2x4xf32>
    %260 = arith.addf %259, %254 : vector<2x4xf32>
    %261 = arith.truncf %260 : vector<2x4xf32> to vector<2x4xbf16>
    %cst_83 = arith.constant dense<0.000000e+00> : vector<2x32xf32>
    %262 = tpu.matmul %261, %61, %cst_83 {dimension_numbers = #tpu.dot_dimension_numbers<[1], [0], [0], [1], [0, 0, 1, 1], [], []>} : vector<2x4xbf16>, vector<4x32xbf16>, vector<2x32xf32> -> vector<2x32xf32>
    %263 = arith.addf %262, %50 : vector<2x32xf32>
    %cst_84 = arith.constant 2.000000e+01 : f32
    %264 = vector.broadcast %cst_84 : f32 to vector<2x32xf32>
    %265 = arith.minimumf %263, %264 : vector<2x32xf32>
    %266 = math.exp %265 : vector<2x32xf32>
    %cst_85 = arith.constant 2.000000e+00 : f32
    %267 = vector.broadcast %cst_85 : f32 to vector<2x32xf32>
    %268 = arith.addf %266, %267 : vector<2x32xf32>
    %269 = arith.mulf %266, %268 : vector<2x32xf32>
    %270 = arith.mulf %263, %269 : vector<2x32xf32>
    %cst_86 = arith.constant 2.000000e+00 : f32
    %271 = vector.broadcast %cst_86 : f32 to vector<2x32xf32>
    %272 = arith.addf %269, %271 : vector<2x32xf32>
    %273 = tpu.reciprocal %272 {approx = true} : vector<2x32xf32> -> vector<2x32xf32>
    %274 = arith.mulf %270, %273 : vector<2x32xf32>
    %275 = arith.truncf %274 : vector<2x32xf32> to vector<2x32xbf16>
    %cst_87 = arith.constant dense<0.000000e+00> : vector<2x32xf32>
    %276 = tpu.matmul %275, %63, %cst_87 {dimension_numbers = #tpu.dot_dimension_numbers<[1], [0], [0], [1], [0, 0, 1, 1], [], []>} : vector<2x32xbf16>, vector<32x32xbf16>, vector<2x32xf32> -> vector<2x32xf32>
    %277 = arith.addf %276, %70 : vector<2x32xf32>
    %cst_88 = arith.constant 2.000000e+01 : f32
    %278 = vector.broadcast %cst_88 : f32 to vector<2x32xf32>
    %279 = arith.minimumf %277, %278 : vector<2x32xf32>
    %280 = math.exp %279 : vector<2x32xf32>
    %cst_89 = arith.constant 2.000000e+00 : f32
    %281 = vector.broadcast %cst_89 : f32 to vector<2x32xf32>
    %282 = arith.addf %280, %281 : vector<2x32xf32>
    %283 = arith.mulf %280, %282 : vector<2x32xf32>
    %284 = arith.mulf %277, %283 : vector<2x32xf32>
    %cst_90 = arith.constant 2.000000e+00 : f32
    %285 = vector.broadcast %cst_90 : f32 to vector<2x32xf32>
    %286 = arith.addf %283, %285 : vector<2x32xf32>
    %287 = tpu.reciprocal %286 {approx = true} : vector<2x32xf32> -> vector<2x32xf32>
    %288 = arith.mulf %284, %287 : vector<2x32xf32>
    %289 = arith.truncf %288 : vector<2x32xf32> to vector<2x32xbf16>
    %cst_91 = arith.constant dense<0.000000e+00> : vector<2x32xf32>
    %290 = tpu.matmul %289, %65, %cst_91 {dimension_numbers = #tpu.dot_dimension_numbers<[1], [0], [0], [1], [0, 0, 1, 1], [], []>} : vector<2x32xbf16>, vector<32x32xbf16>, vector<2x32xf32> -> vector<2x32xf32>
    %291 = arith.addf %290, %73 : vector<2x32xf32>
    %cst_92 = arith.constant 2.000000e+01 : f32
    %292 = vector.broadcast %cst_92 : f32 to vector<2x32xf32>
    %293 = arith.minimumf %291, %292 : vector<2x32xf32>
    %294 = math.exp %293 : vector<2x32xf32>
    %cst_93 = arith.constant 2.000000e+00 : f32
    %295 = vector.broadcast %cst_93 : f32 to vector<2x32xf32>
    %296 = arith.addf %294, %295 : vector<2x32xf32>
    %297 = arith.mulf %294, %296 : vector<2x32xf32>
    %298 = arith.mulf %291, %297 : vector<2x32xf32>
    %cst_94 = arith.constant 2.000000e+00 : f32
    %299 = vector.broadcast %cst_94 : f32 to vector<2x32xf32>
    %300 = arith.addf %297, %299 : vector<2x32xf32>
    %301 = tpu.reciprocal %300 {approx = true} : vector<2x32xf32> -> vector<2x32xf32>
    %302 = arith.mulf %298, %301 : vector<2x32xf32>
    %303 = arith.truncf %302 : vector<2x32xf32> to vector<2x32xbf16>
    %cst_95 = arith.constant dense<0.000000e+00> : vector<2x4xf32>
    %304 = tpu.matmul %303, %67, %cst_95 {dimension_numbers = #tpu.dot_dimension_numbers<[1], [0], [0], [1], [0, 0, 1, 1], [], []>} : vector<2x32xbf16>, vector<32x4xbf16>, vector<2x4xf32> -> vector<2x4xf32>
    %305 = arith.addf %304, %76 : vector<2x4xf32>
    %cst_96 = arith.constant 1.02396369 : f32
    %306 = vector.broadcast %cst_96 : f32 to vector<2x4xf32>
    %307 = arith.mulf %306, %260 : vector<2x4xf32>
    %cst_97 = arith.constant 0.220230818 : f32
    %308 = vector.broadcast %cst_97 : f32 to vector<2x4xf32>
    %309 = arith.mulf %308, %305 : vector<2x4xf32>
    %310 = arith.subf %307, %309 : vector<2x4xf32>
    %cst_98 = arith.constant -1.000000e+00 : f32
    %cst_99 = arith.constant 1.000000e+00 : f32
    %311 = vector.broadcast %cst_98 : f32 to vector<2x4xf32>
    %312 = arith.maximumf %311, %310 : vector<2x4xf32>
    %313 = vector.broadcast %cst_99 : f32 to vector<2x4xf32>
    %314 = arith.minimumf %313, %312 : vector<2x4xf32>
    %c268 = arith.constant 268 : index
    %c0_100 = arith.constant 0 : index
    %315 = vector.load %arg0[%c268, %c0_100] : memref<280x128xf32, #tpu.memory_space<vmem>>, vector<2x4xf32>
    %cst_101 = arith.constant 0.284101486 : f32
    %316 = vector.broadcast %cst_101 : f32 to vector<2x4xf32>
    %317 = arith.mulf %316, %314 : vector<2x4xf32>
    %cst_102 = arith.constant 0.715842068 : f32
    %318 = vector.broadcast %cst_102 : f32 to vector<2x4xf32>
    %319 = arith.mulf %318, %260 : vector<2x4xf32>
    %320 = arith.addf %317, %319 : vector<2x4xf32>
    %321 = arith.addf %320, %315 : vector<2x4xf32>
    %322 = arith.truncf %321 : vector<2x4xf32> to vector<2x4xbf16>
    %cst_103 = arith.constant dense<0.000000e+00> : vector<2x32xf32>
    %323 = tpu.matmul %322, %61, %cst_103 {dimension_numbers = #tpu.dot_dimension_numbers<[1], [0], [0], [1], [0, 0, 1, 1], [], []>} : vector<2x4xbf16>, vector<4x32xbf16>, vector<2x32xf32> -> vector<2x32xf32>
    %324 = arith.addf %323, %47 : vector<2x32xf32>
    %cst_104 = arith.constant 2.000000e+01 : f32
    %325 = vector.broadcast %cst_104 : f32 to vector<2x32xf32>
    %326 = arith.minimumf %324, %325 : vector<2x32xf32>
    %327 = math.exp %326 : vector<2x32xf32>
    %cst_105 = arith.constant 2.000000e+00 : f32
    %328 = vector.broadcast %cst_105 : f32 to vector<2x32xf32>
    %329 = arith.addf %327, %328 : vector<2x32xf32>
    %330 = arith.mulf %327, %329 : vector<2x32xf32>
    %331 = arith.mulf %324, %330 : vector<2x32xf32>
    %cst_106 = arith.constant 2.000000e+00 : f32
    %332 = vector.broadcast %cst_106 : f32 to vector<2x32xf32>
    %333 = arith.addf %330, %332 : vector<2x32xf32>
    %334 = tpu.reciprocal %333 {approx = true} : vector<2x32xf32> -> vector<2x32xf32>
    %335 = arith.mulf %331, %334 : vector<2x32xf32>
    %336 = arith.truncf %335 : vector<2x32xf32> to vector<2x32xbf16>
    %cst_107 = arith.constant dense<0.000000e+00> : vector<2x32xf32>
    %337 = tpu.matmul %336, %63, %cst_107 {dimension_numbers = #tpu.dot_dimension_numbers<[1], [0], [0], [1], [0, 0, 1, 1], [], []>} : vector<2x32xbf16>, vector<32x32xbf16>, vector<2x32xf32> -> vector<2x32xf32>
    %338 = arith.addf %337, %70 : vector<2x32xf32>
    %cst_108 = arith.constant 2.000000e+01 : f32
    %339 = vector.broadcast %cst_108 : f32 to vector<2x32xf32>
    %340 = arith.minimumf %338, %339 : vector<2x32xf32>
    %341 = math.exp %340 : vector<2x32xf32>
    %cst_109 = arith.constant 2.000000e+00 : f32
    %342 = vector.broadcast %cst_109 : f32 to vector<2x32xf32>
    %343 = arith.addf %341, %342 : vector<2x32xf32>
    %344 = arith.mulf %341, %343 : vector<2x32xf32>
    %345 = arith.mulf %338, %344 : vector<2x32xf32>
    %cst_110 = arith.constant 2.000000e+00 : f32
    %346 = vector.broadcast %cst_110 : f32 to vector<2x32xf32>
    %347 = arith.addf %344, %346 : vector<2x32xf32>
    %348 = tpu.reciprocal %347 {approx = true} : vector<2x32xf32> -> vector<2x32xf32>
    %349 = arith.mulf %345, %348 : vector<2x32xf32>
    %350 = arith.truncf %349 : vector<2x32xf32> to vector<2x32xbf16>
    %cst_111 = arith.constant dense<0.000000e+00> : vector<2x32xf32>
    %351 = tpu.matmul %350, %65, %cst_111 {dimension_numbers = #tpu.dot_dimension_numbers<[1], [0], [0], [1], [0, 0, 1, 1], [], []>} : vector<2x32xbf16>, vector<32x32xbf16>, vector<2x32xf32> -> vector<2x32xf32>
    %352 = arith.addf %351, %73 : vector<2x32xf32>
    %cst_112 = arith.constant 2.000000e+01 : f32
    %353 = vector.broadcast %cst_112 : f32 to vector<2x32xf32>
    %354 = arith.minimumf %352, %353 : vector<2x32xf32>
    %355 = math.exp %354 : vector<2x32xf32>
    %cst_113 = arith.constant 2.000000e+00 : f32
    %356 = vector.broadcast %cst_113 : f32 to vector<2x32xf32>
    %357 = arith.addf %355, %356 : vector<2x32xf32>
    %358 = arith.mulf %355, %357 : vector<2x32xf32>
    %359 = arith.mulf %352, %358 : vector<2x32xf32>
    %cst_114 = arith.constant 2.000000e+00 : f32
    %360 = vector.broadcast %cst_114 : f32 to vector<2x32xf32>
    %361 = arith.addf %358, %360 : vector<2x32xf32>
    %362 = tpu.reciprocal %361 {approx = true} : vector<2x32xf32> -> vector<2x32xf32>
    %363 = arith.mulf %359, %362 : vector<2x32xf32>
    %364 = arith.truncf %363 : vector<2x32xf32> to vector<2x32xbf16>
    %cst_115 = arith.constant dense<0.000000e+00> : vector<2x4xf32>
    %365 = tpu.matmul %364, %67, %cst_115 {dimension_numbers = #tpu.dot_dimension_numbers<[1], [0], [0], [1], [0, 0, 1, 1], [], []>} : vector<2x32xbf16>, vector<32x4xbf16>, vector<2x4xf32> -> vector<2x4xf32>
    %366 = arith.addf %365, %76 : vector<2x4xf32>
    %cst_116 = arith.constant 1.01709712 : f32
    %367 = vector.broadcast %cst_116 : f32 to vector<2x4xf32>
    %368 = arith.mulf %367, %321 : vector<2x4xf32>
    %cst_117 = arith.constant 0.185705826 : f32
    %369 = vector.broadcast %cst_117 : f32 to vector<2x4xf32>
    %370 = arith.mulf %369, %366 : vector<2x4xf32>
    %371 = arith.subf %368, %370 : vector<2x4xf32>
    %cst_118 = arith.constant -1.000000e+00 : f32
    %cst_119 = arith.constant 1.000000e+00 : f32
    %372 = vector.broadcast %cst_118 : f32 to vector<2x4xf32>
    %373 = arith.maximumf %372, %371 : vector<2x4xf32>
    %374 = vector.broadcast %cst_119 : f32 to vector<2x4xf32>
    %375 = arith.minimumf %374, %373 : vector<2x4xf32>
    %c266 = arith.constant 266 : index
    %c0_120 = arith.constant 0 : index
    %376 = vector.load %arg0[%c266, %c0_120] : memref<280x128xf32, #tpu.memory_space<vmem>>, vector<2x4xf32>
    %cst_121 = arith.constant 0.330855429 : f32
    %377 = vector.broadcast %cst_121 : f32 to vector<2x4xf32>
    %378 = arith.mulf %377, %375 : vector<2x4xf32>
    %cst_122 = arith.constant 0.669112503 : f32
    %379 = vector.broadcast %cst_122 : f32 to vector<2x4xf32>
    %380 = arith.mulf %379, %321 : vector<2x4xf32>
    %381 = arith.addf %378, %380 : vector<2x4xf32>
    %382 = arith.addf %381, %376 : vector<2x4xf32>
    %383 = arith.truncf %382 : vector<2x4xf32> to vector<2x4xbf16>
    %cst_123 = arith.constant dense<0.000000e+00> : vector<2x32xf32>
    %384 = tpu.matmul %383, %61, %cst_123 {dimension_numbers = #tpu.dot_dimension_numbers<[1], [0], [0], [1], [0, 0, 1, 1], [], []>} : vector<2x4xbf16>, vector<4x32xbf16>, vector<2x32xf32> -> vector<2x32xf32>
    %385 = arith.addf %384, %44 : vector<2x32xf32>
    %cst_124 = arith.constant 2.000000e+01 : f32
    %386 = vector.broadcast %cst_124 : f32 to vector<2x32xf32>
    %387 = arith.minimumf %385, %386 : vector<2x32xf32>
    %388 = math.exp %387 : vector<2x32xf32>
    %cst_125 = arith.constant 2.000000e+00 : f32
    %389 = vector.broadcast %cst_125 : f32 to vector<2x32xf32>
    %390 = arith.addf %388, %389 : vector<2x32xf32>
    %391 = arith.mulf %388, %390 : vector<2x32xf32>
    %392 = arith.mulf %385, %391 : vector<2x32xf32>
    %cst_126 = arith.constant 2.000000e+00 : f32
    %393 = vector.broadcast %cst_126 : f32 to vector<2x32xf32>
    %394 = arith.addf %391, %393 : vector<2x32xf32>
    %395 = tpu.reciprocal %394 {approx = true} : vector<2x32xf32> -> vector<2x32xf32>
    %396 = arith.mulf %392, %395 : vector<2x32xf32>
    %397 = arith.truncf %396 : vector<2x32xf32> to vector<2x32xbf16>
    %cst_127 = arith.constant dense<0.000000e+00> : vector<2x32xf32>
    %398 = tpu.matmul %397, %63, %cst_127 {dimension_numbers = #tpu.dot_dimension_numbers<[1], [0], [0], [1], [0, 0, 1, 1], [], []>} : vector<2x32xbf16>, vector<32x32xbf16>, vector<2x32xf32> -> vector<2x32xf32>
    %399 = arith.addf %398, %70 : vector<2x32xf32>
    %cst_128 = arith.constant 2.000000e+01 : f32
    %400 = vector.broadcast %cst_128 : f32 to vector<2x32xf32>
    %401 = arith.minimumf %399, %400 : vector<2x32xf32>
    %402 = math.exp %401 : vector<2x32xf32>
    %cst_129 = arith.constant 2.000000e+00 : f32
    %403 = vector.broadcast %cst_129 : f32 to vector<2x32xf32>
    %404 = arith.addf %402, %403 : vector<2x32xf32>
    %405 = arith.mulf %402, %404 : vector<2x32xf32>
    %406 = arith.mulf %399, %405 : vector<2x32xf32>
    %cst_130 = arith.constant 2.000000e+00 : f32
    %407 = vector.broadcast %cst_130 : f32 to vector<2x32xf32>
    %408 = arith.addf %405, %407 : vector<2x32xf32>
    %409 = tpu.reciprocal %408 {approx = true} : vector<2x32xf32> -> vector<2x32xf32>
    %410 = arith.mulf %406, %409 : vector<2x32xf32>
    %411 = arith.truncf %410 : vector<2x32xf32> to vector<2x32xbf16>
    %cst_131 = arith.constant dense<0.000000e+00> : vector<2x32xf32>
    %412 = tpu.matmul %411, %65, %cst_131 {dimension_numbers = #tpu.dot_dimension_numbers<[1], [0], [0], [1], [0, 0, 1, 1], [], []>} : vector<2x32xbf16>, vector<32x32xbf16>, vector<2x32xf32> -> vector<2x32xf32>
    %413 = arith.addf %412, %73 : vector<2x32xf32>
    %cst_132 = arith.constant 2.000000e+01 : f32
    %414 = vector.broadcast %cst_132 : f32 to vector<2x32xf32>
    %415 = arith.minimumf %413, %414 : vector<2x32xf32>
    %416 = math.exp %415 : vector<2x32xf32>
    %cst_133 = arith.constant 2.000000e+00 : f32
    %417 = vector.broadcast %cst_133 : f32 to vector<2x32xf32>
    %418 = arith.addf %416, %417 : vector<2x32xf32>
    %419 = arith.mulf %416, %418 : vector<2x32xf32>
    %420 = arith.mulf %413, %419 : vector<2x32xf32>
    %cst_134 = arith.constant 2.000000e+00 : f32
    %421 = vector.broadcast %cst_134 : f32 to vector<2x32xf32>
    %422 = arith.addf %419, %421 : vector<2x32xf32>
    %423 = tpu.reciprocal %422 {approx = true} : vector<2x32xf32> -> vector<2x32xf32>
    %424 = arith.mulf %420, %423 : vector<2x32xf32>
    %425 = arith.truncf %424 : vector<2x32xf32> to vector<2x32xbf16>
    %cst_135 = arith.constant dense<0.000000e+00> : vector<2x4xf32>
    %426 = tpu.matmul %425, %67, %cst_135 {dimension_numbers = #tpu.dot_dimension_numbers<[1], [0], [0], [1], [0, 0, 1, 1], [], []>} : vector<2x32xbf16>, vector<32x4xbf16>, vector<2x4xf32> -> vector<2x4xf32>
    %427 = arith.addf %426, %76 : vector<2x4xf32>
    %cst_136 = arith.constant 1.01140809 : f32
    %428 = vector.broadcast %cst_136 : f32 to vector<2x4xf32>
    %429 = arith.mulf %428, %382 : vector<2x4xf32>
    %cst_137 = arith.constant 0.151480556 : f32
    %430 = vector.broadcast %cst_137 : f32 to vector<2x4xf32>
    %431 = arith.mulf %430, %427 : vector<2x4xf32>
    %432 = arith.subf %429, %431 : vector<2x4xf32>
    %cst_138 = arith.constant -1.000000e+00 : f32
    %cst_139 = arith.constant 1.000000e+00 : f32
    %433 = vector.broadcast %cst_138 : f32 to vector<2x4xf32>
    %434 = arith.maximumf %433, %432 : vector<2x4xf32>
    %435 = vector.broadcast %cst_139 : f32 to vector<2x4xf32>
    %436 = arith.minimumf %435, %434 : vector<2x4xf32>
    %c264 = arith.constant 264 : index
    %c0_140 = arith.constant 0 : index
    %437 = vector.load %arg0[%c264, %c0_140] : memref<280x128xf32, #tpu.memory_space<vmem>>, vector<2x4xf32>
    %cst_141 = arith.constant 0.39601925 : f32
    %438 = vector.broadcast %cst_141 : f32 to vector<2x4xf32>
    %439 = arith.mulf %438, %436 : vector<2x4xf32>
    %cst_142 = arith.constant 0.603964508 : f32
    %440 = vector.broadcast %cst_142 : f32 to vector<2x4xf32>
    %441 = arith.mulf %440, %382 : vector<2x4xf32>
    %442 = arith.addf %439, %441 : vector<2x4xf32>
    %443 = arith.addf %442, %437 : vector<2x4xf32>
    %444 = arith.truncf %443 : vector<2x4xf32> to vector<2x4xbf16>
    %cst_143 = arith.constant dense<0.000000e+00> : vector<2x32xf32>
    %445 = tpu.matmul %444, %61, %cst_143 {dimension_numbers = #tpu.dot_dimension_numbers<[1], [0], [0], [1], [0, 0, 1, 1], [], []>} : vector<2x4xbf16>, vector<4x32xbf16>, vector<2x32xf32> -> vector<2x32xf32>
    %446 = arith.addf %445, %41 : vector<2x32xf32>
    %cst_144 = arith.constant 2.000000e+01 : f32
    %447 = vector.broadcast %cst_144 : f32 to vector<2x32xf32>
    %448 = arith.minimumf %446, %447 : vector<2x32xf32>
    %449 = math.exp %448 : vector<2x32xf32>
    %cst_145 = arith.constant 2.000000e+00 : f32
    %450 = vector.broadcast %cst_145 : f32 to vector<2x32xf32>
    %451 = arith.addf %449, %450 : vector<2x32xf32>
    %452 = arith.mulf %449, %451 : vector<2x32xf32>
    %453 = arith.mulf %446, %452 : vector<2x32xf32>
    %cst_146 = arith.constant 2.000000e+00 : f32
    %454 = vector.broadcast %cst_146 : f32 to vector<2x32xf32>
    %455 = arith.addf %452, %454 : vector<2x32xf32>
    %456 = tpu.reciprocal %455 {approx = true} : vector<2x32xf32> -> vector<2x32xf32>
    %457 = arith.mulf %453, %456 : vector<2x32xf32>
    %458 = arith.truncf %457 : vector<2x32xf32> to vector<2x32xbf16>
    %cst_147 = arith.constant dense<0.000000e+00> : vector<2x32xf32>
    %459 = tpu.matmul %458, %63, %cst_147 {dimension_numbers = #tpu.dot_dimension_numbers<[1], [0], [0], [1], [0, 0, 1, 1], [], []>} : vector<2x32xbf16>, vector<32x32xbf16>, vector<2x32xf32> -> vector<2x32xf32>
    %460 = arith.addf %459, %70 : vector<2x32xf32>
    %cst_148 = arith.constant 2.000000e+01 : f32
    %461 = vector.broadcast %cst_148 : f32 to vector<2x32xf32>
    %462 = arith.minimumf %460, %461 : vector<2x32xf32>
    %463 = math.exp %462 : vector<2x32xf32>
    %cst_149 = arith.constant 2.000000e+00 : f32
    %464 = vector.broadcast %cst_149 : f32 to vector<2x32xf32>
    %465 = arith.addf %463, %464 : vector<2x32xf32>
    %466 = arith.mulf %463, %465 : vector<2x32xf32>
    %467 = arith.mulf %460, %466 : vector<2x32xf32>
    %cst_150 = arith.constant 2.000000e+00 : f32
    %468 = vector.broadcast %cst_150 : f32 to vector<2x32xf32>
    %469 = arith.addf %466, %468 : vector<2x32xf32>
    %470 = tpu.reciprocal %469 {approx = true} : vector<2x32xf32> -> vector<2x32xf32>
    %471 = arith.mulf %467, %470 : vector<2x32xf32>
    %472 = arith.truncf %471 : vector<2x32xf32> to vector<2x32xbf16>
    %cst_151 = arith.constant dense<0.000000e+00> : vector<2x32xf32>
    %473 = tpu.matmul %472, %65, %cst_151 {dimension_numbers = #tpu.dot_dimension_numbers<[1], [0], [0], [1], [0, 0, 1, 1], [], []>} : vector<2x32xbf16>, vector<32x32xbf16>, vector<2x32xf32> -> vector<2x32xf32>
    %474 = arith.addf %473, %73 : vector<2x32xf32>
    %cst_152 = arith.constant 2.000000e+01 : f32
    %475 = vector.broadcast %cst_152 : f32 to vector<2x32xf32>
    %476 = arith.minimumf %474, %475 : vector<2x32xf32>
    %477 = math.exp %476 : vector<2x32xf32>
    %cst_153 = arith.constant 2.000000e+00 : f32
    %478 = vector.broadcast %cst_153 : f32 to vector<2x32xf32>
    %479 = arith.addf %477, %478 : vector<2x32xf32>
    %480 = arith.mulf %477, %479 : vector<2x32xf32>
    %481 = arith.mulf %474, %480 : vector<2x32xf32>
    %cst_154 = arith.constant 2.000000e+00 : f32
    %482 = vector.broadcast %cst_154 : f32 to vector<2x32xf32>
    %483 = arith.addf %480, %482 : vector<2x32xf32>
    %484 = tpu.reciprocal %483 {approx = true} : vector<2x32xf32> -> vector<2x32xf32>
    %485 = arith.mulf %481, %484 : vector<2x32xf32>
    %486 = arith.truncf %485 : vector<2x32xf32> to vector<2x32xbf16>
    %cst_155 = arith.constant dense<0.000000e+00> : vector<2x4xf32>
    %487 = tpu.matmul %486, %67, %cst_155 {dimension_numbers = #tpu.dot_dimension_numbers<[1], [0], [0], [1], [0, 0, 1, 1], [], []>} : vector<2x32xbf16>, vector<32x4xbf16>, vector<2x4xf32> -> vector<2x4xf32>
    %488 = arith.addf %487, %76 : vector<2x4xf32>
    %cst_156 = arith.constant 1.00687468 : f32
    %489 = vector.broadcast %cst_156 : f32 to vector<2x4xf32>
    %490 = arith.mulf %489, %443 : vector<2x4xf32>
    %cst_157 = arith.constant 0.117459297 : f32
    %491 = vector.broadcast %cst_157 : f32 to vector<2x4xf32>
    %492 = arith.mulf %491, %488 : vector<2x4xf32>
    %493 = arith.subf %490, %492 : vector<2x4xf32>
    %cst_158 = arith.constant -1.000000e+00 : f32
    %cst_159 = arith.constant 1.000000e+00 : f32
    %494 = vector.broadcast %cst_158 : f32 to vector<2x4xf32>
    %495 = arith.maximumf %494, %493 : vector<2x4xf32>
    %496 = vector.broadcast %cst_159 : f32 to vector<2x4xf32>
    %497 = arith.minimumf %496, %495 : vector<2x4xf32>
    %c262 = arith.constant 262 : index
    %c0_160 = arith.constant 0 : index
    %498 = vector.load %arg0[%c262, %c0_160] : memref<280x128xf32, #tpu.memory_space<vmem>>, vector<2x4xf32>
    %cst_161 = arith.constant 0.493057638 : f32
    %499 = vector.broadcast %cst_161 : f32 to vector<2x4xf32>
    %500 = arith.mulf %499, %497 : vector<2x4xf32>
    %cst_162 = arith.constant 0.506934762 : f32
    %501 = vector.broadcast %cst_162 : f32 to vector<2x4xf32>
    %502 = arith.mulf %501, %443 : vector<2x4xf32>
    %503 = arith.addf %500, %502 : vector<2x4xf32>
    %504 = arith.addf %503, %498 : vector<2x4xf32>
    %505 = arith.truncf %504 : vector<2x4xf32> to vector<2x4xbf16>
    %cst_163 = arith.constant dense<0.000000e+00> : vector<2x32xf32>
    %506 = tpu.matmul %505, %61, %cst_163 {dimension_numbers = #tpu.dot_dimension_numbers<[1], [0], [0], [1], [0, 0, 1, 1], [], []>} : vector<2x4xbf16>, vector<4x32xbf16>, vector<2x32xf32> -> vector<2x32xf32>
    %507 = arith.addf %506, %38 : vector<2x32xf32>
    %cst_164 = arith.constant 2.000000e+01 : f32
    %508 = vector.broadcast %cst_164 : f32 to vector<2x32xf32>
    %509 = arith.minimumf %507, %508 : vector<2x32xf32>
    %510 = math.exp %509 : vector<2x32xf32>
    %cst_165 = arith.constant 2.000000e+00 : f32
    %511 = vector.broadcast %cst_165 : f32 to vector<2x32xf32>
    %512 = arith.addf %510, %511 : vector<2x32xf32>
    %513 = arith.mulf %510, %512 : vector<2x32xf32>
    %514 = arith.mulf %507, %513 : vector<2x32xf32>
    %cst_166 = arith.constant 2.000000e+00 : f32
    %515 = vector.broadcast %cst_166 : f32 to vector<2x32xf32>
    %516 = arith.addf %513, %515 : vector<2x32xf32>
    %517 = tpu.reciprocal %516 {approx = true} : vector<2x32xf32> -> vector<2x32xf32>
    %518 = arith.mulf %514, %517 : vector<2x32xf32>
    %519 = arith.truncf %518 : vector<2x32xf32> to vector<2x32xbf16>
    %cst_167 = arith.constant dense<0.000000e+00> : vector<2x32xf32>
    %520 = tpu.matmul %519, %63, %cst_167 {dimension_numbers = #tpu.dot_dimension_numbers<[1], [0], [0], [1], [0, 0, 1, 1], [], []>} : vector<2x32xbf16>, vector<32x32xbf16>, vector<2x32xf32> -> vector<2x32xf32>
    %521 = arith.addf %520, %70 : vector<2x32xf32>
    %cst_168 = arith.constant 2.000000e+01 : f32
    %522 = vector.broadcast %cst_168 : f32 to vector<2x32xf32>
    %523 = arith.minimumf %521, %522 : vector<2x32xf32>
    %524 = math.exp %523 : vector<2x32xf32>
    %cst_169 = arith.constant 2.000000e+00 : f32
    %525 = vector.broadcast %cst_169 : f32 to vector<2x32xf32>
    %526 = arith.addf %524, %525 : vector<2x32xf32>
    %527 = arith.mulf %524, %526 : vector<2x32xf32>
    %528 = arith.mulf %521, %527 : vector<2x32xf32>
    %cst_170 = arith.constant 2.000000e+00 : f32
    %529 = vector.broadcast %cst_170 : f32 to vector<2x32xf32>
    %530 = arith.addf %527, %529 : vector<2x32xf32>
    %531 = tpu.reciprocal %530 {approx = true} : vector<2x32xf32> -> vector<2x32xf32>
    %532 = arith.mulf %528, %531 : vector<2x32xf32>
    %533 = arith.truncf %532 : vector<2x32xf32> to vector<2x32xbf16>
    %cst_171 = arith.constant dense<0.000000e+00> : vector<2x32xf32>
    %534 = tpu.matmul %533, %65, %cst_171 {dimension_numbers = #tpu.dot_dimension_numbers<[1], [0], [0], [1], [0, 0, 1, 1], [], []>} : vector<2x32xbf16>, vector<32x32xbf16>, vector<2x32xf32> -> vector<2x32xf32>
    %535 = arith.addf %534, %73 : vector<2x32xf32>
    %cst_172 = arith.constant 2.000000e+01 : f32
    %536 = vector.broadcast %cst_172 : f32 to vector<2x32xf32>
    %537 = arith.minimumf %535, %536 : vector<2x32xf32>
    %538 = math.exp %537 : vector<2x32xf32>
    %cst_173 = arith.constant 2.000000e+00 : f32
    %539 = vector.broadcast %cst_173 : f32 to vector<2x32xf32>
    %540 = arith.addf %538, %539 : vector<2x32xf32>
    %541 = arith.mulf %538, %540 : vector<2x32xf32>
    %542 = arith.mulf %535, %541 : vector<2x32xf32>
    %cst_174 = arith.constant 2.000000e+00 : f32
    %543 = vector.broadcast %cst_174 : f32 to vector<2x32xf32>
    %544 = arith.addf %541, %543 : vector<2x32xf32>
    %545 = tpu.reciprocal %544 {approx = true} : vector<2x32xf32> -> vector<2x32xf32>
    %546 = arith.mulf %542, %545 : vector<2x32xf32>
    %547 = arith.truncf %546 : vector<2x32xf32> to vector<2x32xbf16>
    %cst_175 = arith.constant dense<0.000000e+00> : vector<2x4xf32>
    %548 = tpu.matmul %547, %67, %cst_175 {dimension_numbers = #tpu.dot_dimension_numbers<[1], [0], [0], [1], [0, 0, 1, 1], [], []>} : vector<2x32xbf16>, vector<32x4xbf16>, vector<2x4xf32> -> vector<2x4xf32>
    %549 = arith.addf %548, %76 : vector<2x4xf32>
    %cst_176 = arith.constant 1.00347912 : f32
    %550 = vector.broadcast %cst_176 : f32 to vector<2x4xf32>
    %551 = arith.mulf %550, %504 : vector<2x4xf32>
    %cst_177 = arith.constant 0.0834889561 : f32
    %552 = vector.broadcast %cst_177 : f32 to vector<2x4xf32>
    %553 = arith.mulf %552, %549 : vector<2x4xf32>
    %554 = arith.subf %551, %553 : vector<2x4xf32>
    %cst_178 = arith.constant -1.000000e+00 : f32
    %cst_179 = arith.constant 1.000000e+00 : f32
    %555 = vector.broadcast %cst_178 : f32 to vector<2x4xf32>
    %556 = arith.maximumf %555, %554 : vector<2x4xf32>
    %557 = vector.broadcast %cst_179 : f32 to vector<2x4xf32>
    %558 = arith.minimumf %557, %556 : vector<2x4xf32>
    %c260 = arith.constant 260 : index
    %c0_180 = arith.constant 0 : index
    %559 = vector.load %arg0[%c260, %c0_180] : memref<280x128xf32, #tpu.memory_space<vmem>>, vector<2x4xf32>
    %cst_181 = arith.constant 0.652506053 : f32
    %560 = vector.broadcast %cst_181 : f32 to vector<2x4xf32>
    %561 = arith.mulf %560, %558 : vector<2x4xf32>
    %cst_182 = arith.constant 0.347495914 : f32
    %562 = vector.broadcast %cst_182 : f32 to vector<2x4xf32>
    %563 = arith.mulf %562, %504 : vector<2x4xf32>
    %564 = arith.addf %561, %563 : vector<2x4xf32>
    %565 = arith.addf %564, %559 : vector<2x4xf32>
    %566 = arith.truncf %565 : vector<2x4xf32> to vector<2x4xbf16>
    %cst_183 = arith.constant dense<0.000000e+00> : vector<2x32xf32>
    %567 = tpu.matmul %566, %61, %cst_183 {dimension_numbers = #tpu.dot_dimension_numbers<[1], [0], [0], [1], [0, 0, 1, 1], [], []>} : vector<2x4xbf16>, vector<4x32xbf16>, vector<2x32xf32> -> vector<2x32xf32>
    %568 = arith.addf %567, %35 : vector<2x32xf32>
    %cst_184 = arith.constant 2.000000e+01 : f32
    %569 = vector.broadcast %cst_184 : f32 to vector<2x32xf32>
    %570 = arith.minimumf %568, %569 : vector<2x32xf32>
    %571 = math.exp %570 : vector<2x32xf32>
    %cst_185 = arith.constant 2.000000e+00 : f32
    %572 = vector.broadcast %cst_185 : f32 to vector<2x32xf32>
    %573 = arith.addf %571, %572 : vector<2x32xf32>
    %574 = arith.mulf %571, %573 : vector<2x32xf32>
    %575 = arith.mulf %568, %574 : vector<2x32xf32>
    %cst_186 = arith.constant 2.000000e+00 : f32
    %576 = vector.broadcast %cst_186 : f32 to vector<2x32xf32>
    %577 = arith.addf %574, %576 : vector<2x32xf32>
    %578 = tpu.reciprocal %577 {approx = true} : vector<2x32xf32> -> vector<2x32xf32>
    %579 = arith.mulf %575, %578 : vector<2x32xf32>
    %580 = arith.truncf %579 : vector<2x32xf32> to vector<2x32xbf16>
    %cst_187 = arith.constant dense<0.000000e+00> : vector<2x32xf32>
    %581 = tpu.matmul %580, %63, %cst_187 {dimension_numbers = #tpu.dot_dimension_numbers<[1], [0], [0], [1], [0, 0, 1, 1], [], []>} : vector<2x32xbf16>, vector<32x32xbf16>, vector<2x32xf32> -> vector<2x32xf32>
    %582 = arith.addf %581, %70 : vector<2x32xf32>
    %cst_188 = arith.constant 2.000000e+01 : f32
    %583 = vector.broadcast %cst_188 : f32 to vector<2x32xf32>
    %584 = arith.minimumf %582, %583 : vector<2x32xf32>
    %585 = math.exp %584 : vector<2x32xf32>
    %cst_189 = arith.constant 2.000000e+00 : f32
    %586 = vector.broadcast %cst_189 : f32 to vector<2x32xf32>
    %587 = arith.addf %585, %586 : vector<2x32xf32>
    %588 = arith.mulf %585, %587 : vector<2x32xf32>
    %589 = arith.mulf %582, %588 : vector<2x32xf32>
    %cst_190 = arith.constant 2.000000e+00 : f32
    %590 = vector.broadcast %cst_190 : f32 to vector<2x32xf32>
    %591 = arith.addf %588, %590 : vector<2x32xf32>
    %592 = tpu.reciprocal %591 {approx = true} : vector<2x32xf32> -> vector<2x32xf32>
    %593 = arith.mulf %589, %592 : vector<2x32xf32>
    %594 = arith.truncf %593 : vector<2x32xf32> to vector<2x32xbf16>
    %cst_191 = arith.constant dense<0.000000e+00> : vector<2x32xf32>
    %595 = tpu.matmul %594, %65, %cst_191 {dimension_numbers = #tpu.dot_dimension_numbers<[1], [0], [0], [1], [0, 0, 1, 1], [], []>} : vector<2x32xbf16>, vector<32x32xbf16>, vector<2x32xf32> -> vector<2x32xf32>
    %596 = arith.addf %595, %73 : vector<2x32xf32>
    %cst_192 = arith.constant 2.000000e+01 : f32
    %597 = vector.broadcast %cst_192 : f32 to vector<2x32xf32>
    %598 = arith.minimumf %596, %597 : vector<2x32xf32>
    %599 = math.exp %598 : vector<2x32xf32>
    %cst_193 = arith.constant 2.000000e+00 : f32
    %600 = vector.broadcast %cst_193 : f32 to vector<2x32xf32>
    %601 = arith.addf %599, %600 : vector<2x32xf32>
    %602 = arith.mulf %599, %601 : vector<2x32xf32>
    %603 = arith.mulf %596, %602 : vector<2x32xf32>
    %cst_194 = arith.constant 2.000000e+00 : f32
    %604 = vector.broadcast %cst_194 : f32 to vector<2x32xf32>
    %605 = arith.addf %602, %604 : vector<2x32xf32>
    %606 = tpu.reciprocal %605 {approx = true} : vector<2x32xf32> -> vector<2x32xf32>
    %607 = arith.mulf %603, %606 : vector<2x32xf32>
    %608 = arith.truncf %607 : vector<2x32xf32> to vector<2x32xbf16>
    %cst_195 = arith.constant dense<0.000000e+00> : vector<2x4xf32>
    %609 = tpu.matmul %608, %67, %cst_195 {dimension_numbers = #tpu.dot_dimension_numbers<[1], [0], [0], [1], [0, 0, 1, 1], [], []>} : vector<2x32xbf16>, vector<32x4xbf16>, vector<2x4xf32> -> vector<2x4xf32>
    %610 = arith.addf %609, %76 : vector<2x4xf32>
    %cst_196 = arith.constant 1.00120759 : f32
    %611 = vector.broadcast %cst_196 : f32 to vector<2x4xf32>
    %612 = arith.mulf %611, %565 : vector<2x4xf32>
    %cst_197 = arith.constant 0.0491602458 : f32
    %613 = vector.broadcast %cst_197 : f32 to vector<2x4xf32>
    %614 = arith.mulf %613, %610 : vector<2x4xf32>
    %615 = arith.subf %612, %614 : vector<2x4xf32>
    %cst_198 = arith.constant -1.000000e+00 : f32
    %cst_199 = arith.constant 1.000000e+00 : f32
    %616 = vector.broadcast %cst_198 : f32 to vector<2x4xf32>
    %617 = arith.maximumf %616, %615 : vector<2x4xf32>
    %618 = vector.broadcast %cst_199 : f32 to vector<2x4xf32>
    %619 = arith.minimumf %618, %617 : vector<2x4xf32>
    %c258 = arith.constant 258 : index
    %c0_200 = arith.constant 0 : index
    %620 = vector.load %arg0[%c258, %c0_200] : memref<280x128xf32, #tpu.memory_space<vmem>>, vector<2x4xf32>
    %cst_201 = arith.constant 0.95856589 : f32
    %621 = vector.broadcast %cst_201 : f32 to vector<2x4xf32>
    %622 = arith.mulf %621, %619 : vector<2x4xf32>
    %cst_202 = arith.constant 4.143740e-02 : f32
    %623 = vector.broadcast %cst_202 : f32 to vector<2x4xf32>
    %624 = arith.mulf %623, %565 : vector<2x4xf32>
    %625 = arith.addf %622, %624 : vector<2x4xf32>
    %626 = arith.addf %625, %620 : vector<2x4xf32>
    %627 = arith.truncf %626 : vector<2x4xf32> to vector<2x4xbf16>
    %cst_203 = arith.constant dense<0.000000e+00> : vector<2x32xf32>
    %628 = tpu.matmul %627, %61, %cst_203 {dimension_numbers = #tpu.dot_dimension_numbers<[1], [0], [0], [1], [0, 0, 1, 1], [], []>} : vector<2x4xbf16>, vector<4x32xbf16>, vector<2x32xf32> -> vector<2x32xf32>
    %629 = arith.addf %628, %32 : vector<2x32xf32>
    %cst_204 = arith.constant 2.000000e+01 : f32
    %630 = vector.broadcast %cst_204 : f32 to vector<2x32xf32>
    %631 = arith.minimumf %629, %630 : vector<2x32xf32>
    %632 = math.exp %631 : vector<2x32xf32>
    %cst_205 = arith.constant 2.000000e+00 : f32
    %633 = vector.broadcast %cst_205 : f32 to vector<2x32xf32>
    %634 = arith.addf %632, %633 : vector<2x32xf32>
    %635 = arith.mulf %632, %634 : vector<2x32xf32>
    %636 = arith.mulf %629, %635 : vector<2x32xf32>
    %cst_206 = arith.constant 2.000000e+00 : f32
    %637 = vector.broadcast %cst_206 : f32 to vector<2x32xf32>
    %638 = arith.addf %635, %637 : vector<2x32xf32>
    %639 = tpu.reciprocal %638 {approx = true} : vector<2x32xf32> -> vector<2x32xf32>
    %640 = arith.mulf %636, %639 : vector<2x32xf32>
    %641 = arith.truncf %640 : vector<2x32xf32> to vector<2x32xbf16>
    %cst_207 = arith.constant dense<0.000000e+00> : vector<2x32xf32>
    %642 = tpu.matmul %641, %63, %cst_207 {dimension_numbers = #tpu.dot_dimension_numbers<[1], [0], [0], [1], [0, 0, 1, 1], [], []>} : vector<2x32xbf16>, vector<32x32xbf16>, vector<2x32xf32> -> vector<2x32xf32>
    %643 = arith.addf %642, %70 : vector<2x32xf32>
    %cst_208 = arith.constant 2.000000e+01 : f32
    %644 = vector.broadcast %cst_208 : f32 to vector<2x32xf32>
    %645 = arith.minimumf %643, %644 : vector<2x32xf32>
    %646 = math.exp %645 : vector<2x32xf32>
    %cst_209 = arith.constant 2.000000e+00 : f32
    %647 = vector.broadcast %cst_209 : f32 to vector<2x32xf32>
    %648 = arith.addf %646, %647 : vector<2x32xf32>
    %649 = arith.mulf %646, %648 : vector<2x32xf32>
    %650 = arith.mulf %643, %649 : vector<2x32xf32>
    %cst_210 = arith.constant 2.000000e+00 : f32
    %651 = vector.broadcast %cst_210 : f32 to vector<2x32xf32>
    %652 = arith.addf %649, %651 : vector<2x32xf32>
    %653 = tpu.reciprocal %652 {approx = true} : vector<2x32xf32> -> vector<2x32xf32>
    %654 = arith.mulf %650, %653 : vector<2x32xf32>
    %655 = arith.truncf %654 : vector<2x32xf32> to vector<2x32xbf16>
    %cst_211 = arith.constant dense<0.000000e+00> : vector<2x32xf32>
    %656 = tpu.matmul %655, %65, %cst_211 {dimension_numbers = #tpu.dot_dimension_numbers<[1], [0], [0], [1], [0, 0, 1, 1], [], []>} : vector<2x32xbf16>, vector<32x32xbf16>, vector<2x32xf32> -> vector<2x32xf32>
    %657 = arith.addf %656, %73 : vector<2x32xf32>
    %cst_212 = arith.constant 2.000000e+01 : f32
    %658 = vector.broadcast %cst_212 : f32 to vector<2x32xf32>
    %659 = arith.minimumf %657, %658 : vector<2x32xf32>
    %660 = math.exp %659 : vector<2x32xf32>
    %cst_213 = arith.constant 2.000000e+00 : f32
    %661 = vector.broadcast %cst_213 : f32 to vector<2x32xf32>
    %662 = arith.addf %660, %661 : vector<2x32xf32>
    %663 = arith.mulf %660, %662 : vector<2x32xf32>
    %664 = arith.mulf %657, %663 : vector<2x32xf32>
    %cst_214 = arith.constant 2.000000e+00 : f32
    %665 = vector.broadcast %cst_214 : f32 to vector<2x32xf32>
    %666 = arith.addf %663, %665 : vector<2x32xf32>
    %667 = tpu.reciprocal %666 {approx = true} : vector<2x32xf32> -> vector<2x32xf32>
    %668 = arith.mulf %664, %667 : vector<2x32xf32>
    %669 = arith.truncf %668 : vector<2x32xf32> to vector<2x32xbf16>
    %cst_215 = arith.constant dense<0.000000e+00> : vector<2x4xf32>
    %670 = tpu.matmul %669, %67, %cst_215 {dimension_numbers = #tpu.dot_dimension_numbers<[1], [0], [0], [1], [0, 0, 1, 1], [], []>} : vector<2x32xbf16>, vector<32x4xbf16>, vector<2x4xf32> -> vector<2x4xf32>
    %671 = arith.addf %670, %76 : vector<2x4xf32>
    %cst_216 = arith.constant 1.000050e+00 : f32
    %672 = vector.broadcast %cst_216 : f32 to vector<2x4xf32>
    %673 = arith.mulf %672, %626 : vector<2x4xf32>
    %cst_217 = arith.constant 0.0100008296 : f32
    %674 = vector.broadcast %cst_217 : f32 to vector<2x4xf32>
    %675 = arith.mulf %674, %671 : vector<2x4xf32>
    %676 = arith.subf %673, %675 : vector<2x4xf32>
    %cst_218 = arith.constant -1.000000e+00 : f32
    %cst_219 = arith.constant 1.000000e+00 : f32
    %677 = vector.broadcast %cst_218 : f32 to vector<2x4xf32>
    %678 = arith.maximumf %677, %676 : vector<2x4xf32>
    %679 = vector.broadcast %cst_219 : f32 to vector<2x4xf32>
    %680 = arith.minimumf %679, %678 : vector<2x4xf32>
    %c256 = arith.constant 256 : index
    %c0_220 = arith.constant 0 : index
    %681 = vector.load %arg0[%c256, %c0_220] : memref<280x128xf32, #tpu.memory_space<vmem>>, vector<2x4xf32>
    %cst_221 = arith.constant 0.99983406 : f32
    %682 = vector.broadcast %cst_221 : f32 to vector<2x4xf32>
    %683 = arith.mulf %682, %680 : vector<2x4xf32>
    %cst_222 = arith.constant 0.000000e+00 : f32
    %684 = vector.broadcast %cst_222 : f32 to vector<2x4xf32>
    %685 = arith.mulf %684, %626 : vector<2x4xf32>
    %686 = arith.addf %683, %685 : vector<2x4xf32>
    %687 = arith.addf %686, %681 : vector<2x4xf32>
    %cst_223 = arith.constant -1.000000e+00 : f32
    %cst_224 = arith.constant 1.000000e+00 : f32
    %688 = vector.broadcast %cst_223 : f32 to vector<2x4xf32>
    %689 = arith.maximumf %688, %687 : vector<2x4xf32>
    %690 = vector.broadcast %cst_224 : f32 to vector<2x4xf32>
    %691 = arith.minimumf %690, %689 : vector<2x4xf32>
    %c0_225 = arith.constant 0 : index
    %c0_226 = arith.constant 0 : index
    %692 = vector.load %arg1[%c0_225, %c0_226] : memref<2x4xf32, #tpu.memory_space<vmem>>, vector<2x4xf32>
    tpu.vector_store %arg1[%c0_225, %c0_226], %691 {strides = array<i32>} : memref<2x4xf32, #tpu.memory_space<vmem>>, vector<2x4xf32>,
    return
  }
}

</mosaic_0001>

<bundles_post_ra>
// kernel: tpu_custom_call.1
= control target key start
LH: loop header
LB: loop body
LE: loop exit
PB: predicated region body
PF: predicated region fallthrough
CT: control target
= control target key end

     0   :  { %6 = vsyncpa [#allocation3], 0  ;;  %s3763_s0 = inlined_call_operand.hbm [shape: f32[280,128], index: 0, kind: input, shape index: {}]   ;;  %s3764_s1 = inlined_call_operand.hbm [shape: f32[2,4], index: 1, kind: output, shape index: {}]  }
   0x1   :  { %7 = vsyncpa [#allocation4], 0  ;;  %s3329_s6 = smov [#allocation2]  }
   0x2   :  { %s13_s7 = sshll.u32 %s3329_s6, 4  ;;  %s14_s7 = int_to_ptr.vmem [resolvable:$true] %s13_s7 }
   0x3   :  { %s3293_s8 = scalar_lea.vmem %s14_s7, 4480  ;;  %p3298_p1 = scmp.lt.s32.totalorder %s14_s7, %s14_s7 }
   0x4   :  { %p3294_p0 = scmp.ne.s32.totalorder %s14_s7, %s3293_s8  ;;  %p3299_p2 = scmp.lt.s32.totalorder %s3293_s8, %s3293_s8 }
   0x6   :  { %p3300_p3 = por %p3299_p2, %p3298_p1 }
   0x8   :  { %p3301_p4 = pnand %p3300_p3, %p3294_p0 }
   0xa   :  { %3304 = shalt.err (!%p3301_p4)
}
   0xb   :  { %s3330_s9 = smov 128   ;;  %s3331_s10 = smov 8  }
   0xc   :  { %19 = dma.hbm_to_vmem [thread:$0]  %s3763_s0, 4480, %s14_s7, [#allocation3], %s3330_s9, %s3330_s9, %s3331_s10  }
   0xd   :  { %3325 = dma.done.wait [#allocation3], 4480  }
   0xe   :  { %3326 = vsyncadd [#allocation3], 4294962816  ;;  %vm33_vm0 = vcmask 130048   ;;  %v27_v0 = vld [vmem:[#allocation2 + $0x8] sm:$0xff]  ;;  %v26_v1 = vld [vmem:[#allocation2] sm:$0xff]  ;;  %vm142_vm1 = vcmask 261120   ;;  %v388_v56 = vlaneseq }
   0xf   :  { %v24_v2 = vld [vmem:[#allocation2 + $0xe0] sm:$0xff]  ;;  %2818 = vmatprep.subr.mxu1 %v27_v0  ;;  %v25_v3 = vld [vmem:[#allocation2 + $0xe8] sm:$0x3]  ;;  %v136_v4 = vld [vmem:[#allocation2 + $0x30] sm:$0xff]  ;;  %vm479_vm2 = vcmask 1041408   ;;  %v3332_v35 = vmov 0.0  }
  0x10   :  { %2822 = vmatprep.mubr.msk.f32.mxu1 %vm33_vm0, %v24_v2  ;;  %2819 = vmatpush3.msra.mxu1 %v27_v0  ;;  %v135_v5 = vld [vmem:[#allocation2 + $0x28] sm:$0xff]  ;;  %v134_v6 = vld [vmem:[#allocation2 + $0x20] sm:$0xff]  ;;  %v133_v7 = vld [vmem:[#allocation2 + $0x18] sm:$0xff]  ;;  %vm3333_vm3 = vmmov 0   ;;  %vm475_vm4 = vcmask 31744   ;;  %vm314_vm5 = vcmask 64512  }
  0x11   :  { %2820 = vmatprep.subr.mxu1 %v26_v1  ;;  %v2628_v8 = vld [vmem:[#allocation2 + $0x10] ss:$0 sm:$0xff]  ;;  %v438_v32 = vld [vmem:[#allocation2 + $0x40] sm:$0xf]  ;;  %v224_v34 = vld [vmem:[#allocation2 + $0x48] sm:$0xff]  ;;  %v389_v57 = vshrl.u32 %v388_v56, 7 }
  0x12   :  { %2821 = vmatpush3.msra.mxu1 %v26_v1  ;;  %v225_v31 = vld [vmem:[#allocation2 + $0x50] sm:$0xff]  ;;  %v439_v33 = vpack.c.bf16 %v438_v32, %v438_v32  ;;  %v3356_v37 = vld [vmem:[#allocation2 + $0xf8] sm:$0x3]  ;;  %v443_v50 = vld [vmem:[#allocation2 + $0x80] sm:$0xff]  ;;  %s3334_s0 = smov [#allocation5]   ;;  %vm2611_vm6 = vcmask 25600  }
  0x13   :  { %2823 = vmatmul.mubr.msk.f32.vlgmr.msra.gmra.mxu1 %vm33_vm0, %v25_v3  ;;  %2825 = vmatprep.subr.mxu1 %v136_v4  ;;  %v474_v38 = vpack.c.bf16 %v3356_v37, %v3356_v37  ;;  %v2631_v40 = vld [vmem:[#allocation2 + $0x38] ss:$0 sm:$0xff]  ;;  %v307_v45 = vld [vmem:[#allocation2 + $0xf0] sm:$0x3]  ;;  %v440_v51 = vld [vmem:[#allocation2 + $0x68] sm:$0xff]  ;;  %v390_v58 = vsub.s32 0, %v389_v57 }
  0x14   :  { %2826 = vmatpush3.msra.mxu1 %v136_v4  ;;  %2836 = vmatprep.subr.mxu0 %v225_v31  ;;  %v3353_v36 = vsel %vm479_vm2, %v439_v33, 0  ;;  %v308_v44 = vld [vmem:[#allocation2 + $0x58] sm:$0xff]  ;;  %v441_v53 = vld [vmem:[#allocation2 + $0x70] sm:$0xff]  ;;  %v425_v59 = vsub.s32 7, %v389_v57  ;;  %v420_v60 = vsub.s32 6, %v389_v57  ;;  %v415_v61 = vsub.s32 5, %v389_v57 }
  0x15   :  { %2827 = vmatprep.subr.mxu1 %v135_v5  ;;  %2837 = vmatpush3.msra.mxu0 %v225_v31  ;;  %v442_v49 = vld [vmem:[#allocation2 + $0x78] sm:$0xff]  ;;  %v3377_v55 = vpack.c.bf16 %v441_v53, %v440_v51  ;;  %v410_v62 = vsub.s32 4, %v389_v57  ;;  %v405_v0 = vsub.s32 3, %v389_v57  ;;  %v400_v1 = vsub.s32 2, %v389_v57  ;;  %s2619_s13 = sshll.u32 %s3334_s0, 4  ;;  %s2620_s13 = int_to_ptr.vmem [resolvable:$true] %s2619_s13 }
  0x16   :  { %2828 = vmatpush3.msra.mxu1 %v135_v5  ;;  %2838 = vmatprep.subr.mxu0 %v224_v34  ;;  %v3374_v52 = vpack.c.bf16 %v443_v50, %v442_v49  ;;  %v395_v2 = vsub.s32 1, %v389_v57  ;;  %v2636_v5 = vld [vmem:[#allocation2 + $0x60] ss:$0 sm:$0xff]  ;;  %s3305_s14 = scalar_lea.vmem %s2620_s13, 32  ;;  %p3310_p6 = scmp.lt.s32.totalorder %s2620_s13, %s2620_s13 }
  0x17   :  { %2829 = vmatprep.subr.mxu1 %v134_v6  ;;  %2839 = vmatpush3.msra.mxu0 %v224_v34  ;;  %p3306_p5 = scmp.ne.s32.totalorder %s2620_s13, %s3305_s14  ;;  %p3311_p7 = scmp.lt.s32.totalorder %s3305_s14, %s3305_s14 }
  0x18   :  { %2830 = vmatpush3.msra.mxu1 %v134_v6  ;;  %2843 = vmatprep.subr.mxu0 %v3332_v35 }
  0x19   :  { %2831 = vmatprep.subr.mxu1 %v133_v7  ;;  %p3312_p8 = por %p3311_p7, %p3310_p6 }
  0x1a   :  { %2832 = vmatpush3.msra.mxu1 %v133_v7 }
  0x1b   :  { %2848 = vmatprep.subr.bf16.mxu1 %v3332_v35  ;;  %p3313_p9 = pnand %p3312_p8, %p3306_p5 }
  0xd3   :  { %v2824_v9 = vpop.f32.mrf.mxu1 }
  0xd4   :  { %v112_v10 = vadd.f32 %v2824_v9, %v2628_v8 }
  0xd5   :  { %v106_v11 = vpop.f32.mrf.mxu1 }
  0xd6   :  { %v116_v12 = vmin.f32 %v112_v10, 20.0  ;;  %v107_v13 = vadd.f32 %v2628_v8, %v106_v11 }
  0xd8   :  { %v119_v14 = vmul.f32 1.442695, %v116_v12  ;;  %v115_v15 = vmin.f32 %v107_v13, 20.0 }
  0xda   :  { %3154 = vpow2.f32 %v119_v14  ;;  %v117_v16 = vmul.f32 1.442695, %v115_v15 }
  0xdc   :  { %3156 = vpow2.f32 %v117_v16 }
  0xe7   :  { %v3155_v17 = vpop.eup %3154 }
  0xe8   :  { %v122_v18 = vadd.f32 2.0, %v3155_v17 }
  0xe9   :  { %v3157_v19 = vpop.eup %3156 }
  0xea   :  { %v124_v20 = vmul.f32 %v3155_v17, %v122_v18  ;;  %v121_v21 = vadd.f32 2.0, %v3157_v19 }
  0xec   :  { %v128_v22 = vadd.f32 2.0, %v124_v20  ;;  %v123_v23 = vmul.f32 %v3157_v19, %v121_v21  ;;  %v126_v28 = vmul.f32 %v124_v20, %v112_v10 }
  0xee   :  { %v127_v24 = vadd.f32 2.0, %v123_v23  ;;  %3158 = vrcp.f32 %v128_v22  ;;  %v125_v26 = vmul.f32 %v123_v23, %v107_v13 }
  0xf0   :  { %3160 = vrcp.f32 %v127_v24 }
  0xfb   :  { %v3159_v25 = vpop.eup %3158 }
  0xfc   :  { %v132_v30 = vmul.f32 %v3159_v25, %v126_v28 }
  0xfd   :  { %v3161_v27 = vpop.eup %3160 }
  0xfe   :  { %v131_v29 = vmul.f32 %v3161_v27, %v125_v26 }
 0x100   :  { %2833 = vmatprep.mubr.msk.f32.mxu1 %vm142_vm1, %v131_v29 }
 0x101   :  { %2834 = vmatmul.mubr.msk.f32.vlgmr.msra.gmra.mxu1 %vm142_vm1, %v132_v30 }
 0x102   :  { %2849 = vmatpush3.bf16.msra.mxu1 %v3353_v36  ;;  %2850 = vmatprep.mubr.msk.bf16.mxu1 %vm3333_vm3, %v3332_v35 }
 0x103   :  { %2862 = vmatprep.subr.bf16.mxu1 %v3332_v35 }
 0x105   :  { %2851 = vmatmul.mubr.msk.bf16.vlgmr.msra.gmra.mxu1 %vm475_vm4, %v474_v38 }
 0x106   :  { %2866 = vmatprep.mubr.msk.bf16.mxu1 %vm3333_vm3, %v3332_v35 }
 0x1c1   :  { %v2835_v39 = vpop.f32.mrf.mxu1 }
 0x1c2   :  { %v221_v43 = vadd.f32 %v2835_v39, %v2631_v40 }
 0x1c3   :  { %v215_v41 = vpop.f32.mrf.mxu1 }
 0x1c4   :  { %v216_v42 = vadd.f32 %v2631_v40, %v215_v41 }
 0x1c5   :  { %v517_v46 = vpop.f32.mrf.mxu1 }
 0x1c6   :  { %2840 = vmatprep.mubr.msk.f32.mxu0 %vm33_vm0, %v216_v42  ;;  %v448_v42 = vld [vmem:[#allocation2 + $0xa0] sm:$0xff] }
 0x1c7   :  { %2841 = vmatmul.mubr.msk.f32.vlgmr.msra.gmra.mxu0 %vm33_vm0, %v221_v43  ;;  %v2852_v47 = vpop.f32.mrf.mxu1  ;;  %v449_v43 = vld [vmem:[#allocation2 + $0xa8] sm:$0xff] }
 0x1c8   :  { %2844 = vmatpush3.msra.mxu0 %v308_v44  ;;  %2845 = vmatprep.mubr.msk.f32.mxu0 %vm3333_vm3, %v3332_v35  ;;  %v3403_v44 = vpack.c.bf16 %v449_v43, %v448_v42 }
 0x1c9   :  { %2854 = vmatprep.subr.bf16.mxu0 %v3332_v35  ;;  %v520_v48 = vpop.f32.mrf.mxu1 }
 0x1ca   :  { %2863 = vmatpush3.bf16.msra.mxu1 %v3403_v44  ;;  %v3411_v48 = vld [vmem:[#allocation2 + $0x88] ss:$0 sm:$0xff] }
 0x1cb   :  { %2846 = vmatmul.mubr.msk.f32.vlgmr.msra.gmra.mxu0 %vm314_vm5, %v307_v45  ;;  %v2853_v54 = vpop.f32.mrf.mxu1  ;;  %2864 = vmatprep.subr.bf16.mxu1 %v3332_v35  ;;  %v446_v45 = vld [vmem:[#allocation2 + $0x90] sm:$0xff] }
 0x1cc   :  { %2858 = vmatprep.mubr.msk.bf16.mxu0 %vm3333_vm3, %v3332_v35  ;;  %2855 = vmatpush3.bf16.msra.mxu0 %v3374_v52 }
 0x1cd   :  { %2856 = vmatprep.subr.bf16.mxu0 %v3332_v35 }
 0x1d0   :  { %2857 = vmatpush3.bf16.msra.mxu0 %v3377_v55 }
 0x1d1   :  { %2870 = vmatprep.subr.bf16.mxu0 %v3332_v35 }
 0x287   :  { %v2842_v63 = vpop.f32.mrf.mxu0 }
 0x288   :  { %v431_v3 = vrot.slane %v2842_v63, %v390_v58  ;;  %v436_v15 = vrot.slane %v2842_v63, %v395_v2 }
 0x289   :  { %v298_v4 = vpop.f32.mrf.mxu0 }
 0x28a   :  { %v426_v6 = vrot.slane %v298_v4, %v425_v59  ;;  %v421_v7 = vrot.slane %v298_v4, %v420_v60  ;;  %v416_v8 = vrot.slane %v298_v4, %v415_v61  ;;  %v411_v9 = vrot.slane %v298_v4, %v410_v62 }
 0x28b   :  { %v384_v10 = vpop.f32.mrf.mxu0  ;;  %v406_v11 = vrot.slane %v298_v4, %v405_v0  ;;  %v401_v12 = vrot.slane %v298_v4, %v400_v1  ;;  %v396_v13 = vrot.slane %v298_v4, %v395_v2  ;;  %v391_v14 = vrot.slane %v298_v4, %v390_v58  ;;  %v454_v2 = vld [vmem:[#allocation2 + $0xc8] sm:$0xff] }
 0x28c   :  { %v385_v16 = vadd.f32 %v2636_v5, %v384_v10  ;;  %v452_v5 = vld [vmem:[#allocation2 + $0xb8] sm:$0xff] }
 0x28d   :  { %v2847_v17 = vpop.f32.mrf.mxu0 }
 0x28e   :  { %v437_v18 = vadd.f32 %v436_v15, %v385_v16  ;;  %v3382_v19 = vadd.f32 %v431_v3, %v385_v16  ;;  %v3384_v20 = vadd.f32 %v426_v6, %v385_v16  ;;  %v3386_v21 = vadd.f32 %v421_v7, %v385_v16  ;;  %v455_v3 = vld [vmem:[#allocation2 + $0xd0] sm:$0xff]  ;;  %v453_v6 = vld [vmem:[#allocation2 + $0xc0] sm:$0xff] }
 0x28f   :  { %v3388_v22 = vadd.f32 %v416_v8, %v385_v16  ;;  %v3390_v23 = vadd.f32 %v411_v9, %v385_v16  ;;  %v3392_v24 = vadd.f32 %v406_v11, %v385_v16  ;;  %v3394_v25 = vadd.f32 %v401_v12, %v385_v16  ;;  %v3427_v8 = vld [vmem:[#allocation2 + $0xb0] ss:$0 sm:$0xff] }
 0x290   :  { %v518_v26 = vadd.f32 %v517_v46, %v437_v18  ;;  %v3396_v27 = vadd.f32 %v396_v13, %v385_v16  ;;  %v3398_v28 = vadd.f32 %v391_v14, %v385_v16  ;;  %v447_v46 = vld [vmem:[#allocation2 + $0x98] sm:$0xff]  ;;  %v3419_v4 = vpack.c.bf16 %v455_v3, %v454_v2 }
 0x291   :  { %v3407_v47 = vpack.c.bf16 %v447_v46, %v446_v45  ;;  %v3423_v7 = vpack.c.bf16 %v453_v6, %v452_v5 }
 0x292   :  { %v523_v29 = vmin.f32 %v518_v26, 20.0 }
 0x293   :  { %2865 = vmatpush3.bf16.msra.mxu1 %v3407_v47 }
 0x294   :  { %v524_v30 = vmul.f32 1.442695, %v523_v29  ;;  %2878 = vmatprep.subr.bf16.mxu1 %v3332_v35 }
 0x296   :  { %3162 = vpow2.f32 %v524_v30 }
 0x2a3   :  { %v3163_v31 = vpop.eup %3162 }
 0x2a4   :  { %v526_v32 = vadd.f32 2.0, %v3163_v31 }
 0x2a6   :  { %v527_v33 = vmul.f32 %v3163_v31, %v526_v32 }
 0x2a8   :  { %v529_v34 = vadd.f32 2.0, %v527_v33  ;;  %v528_v38 = vmul.f32 %v527_v33, %v518_v26  ;;  %v3437_v33 = vld [vmem:[#allocation2 + $0xd8] ss:$0 sm:$0xff] }
 0x2aa   :  { %3164 = vrcp.f32 %v529_v34 }
 0x2b7   :  { %v3165_v39 = vpop.eup %3164 }
 0x2b8   :  { %v531_v40 = vmul.f32 %v3165_v39, %v528_v38  ;;  %v682_v39 = vmul.f32 1.0519096, %v3356_v37 }
 0x2ba   :  { %v532_v41 = vpack.c.bf16 %v531_v40, %v531_v40 }
 0x2bc   :  { %2859 = vmatmul.mubr.msk.bf16.vlgmr.msra.gmra.mxu0 %vm142_vm1, %v532_v41 }
 0x2bd   :  { %2874 = vmatprep.mubr.msk.bf16.mxu0 %vm3333_vm3, %v3332_v35  ;;  %2871 = vmatpush3.bf16.msra.mxu0 %v3419_v4 }
 0x2be   :  { %2872 = vmatprep.subr.bf16.mxu0 %v3332_v35 }
 0x2c1   :  { %2873 = vmatpush3.bf16.msra.mxu0 %v3423_v7 }
 0x2c2   :  { %2884 = vmatprep.subr.bf16.mxu0 %v3332_v35 }
 0x37c   :  { %v570_v49 = vpop.f32.mrf.mxu0 }
 0x37d   :  { %v571_v50 = vadd.f32 %v3411_v48, %v570_v49  ;;  %v689_v49 = vmul.f32 0.80027395, %v3356_v37 }
 0x37e   :  { %v2860_v51 = vpop.f32.mrf.mxu0 }
 0x37f   :  { %v576_v53 = vmin.f32 %v571_v50, 20.0  ;;  %v687_v51 = vld [vmem:[#allocation2 + $0x112] sm:$0x3] }
 0x380   :  { %v573_v54 = vpop.f32.mrf.mxu0 }
 0x381   :  { %v577_v56 = vmul.f32 1.442695, %v576_v53 }
 0x382   :  { %v2861_v57 = vpop.f32.mrf.mxu0 }
 0x383   :  { %3166 = vpow2.f32 %v577_v56 }
 0x390   :  { %v3167_v58 = vpop.eup %3166 }
 0x391   :  { %v579_v59 = vadd.f32 2.0, %v3167_v58 }
 0x393   :  { %v580_v60 = vmul.f32 %v3167_v58, %v579_v59 }
 0x395   :  { %v582_v61 = vadd.f32 2.0, %v580_v60  ;;  %v581_v62 = vmul.f32 %v580_v60, %v571_v50 }
 0x397   :  { %3168 = vrcp.f32 %v582_v61 }
 0x3a4   :  { %v3169_v63 = vpop.eup %3168 }
 0x3a5   :  { %v584_v0 = vmul.f32 %v3169_v63, %v581_v62 }
 0x3a7   :  { %v585_v1 = vpack.c.bf16 %v584_v0, %v584_v0 }
 0x3a9   :  { %2867 = vmatmul.mubr.msk.bf16.vlgmr.msra.gmra.mxu1 %vm142_vm1, %v585_v1 }
 0x3aa   :  { %2879 = vmatpush3.bf16.msra.mxu1 %v3353_v36  ;;  %2880 = vmatprep.mubr.msk.bf16.mxu1 %vm3333_vm3, %v3332_v35 }
 0x3ab   :  { %2892 = vmatprep.subr.bf16.mxu1 %v3332_v35 }
 0x469   :  { %v623_v9 = vpop.f32.mrf.mxu1 }
 0x46a   :  { %v624_v10 = vadd.f32 %v3427_v8, %v623_v9 }
 0x46b   :  { %v2868_v11 = vpop.f32.mrf.mxu1 }
 0x46c   :  { %v629_v12 = vmin.f32 %v624_v10, 20.0 }
 0x46d   :  { %v626_v13 = vpop.f32.mrf.mxu1 }
 0x46e   :  { %v630_v14 = vmul.f32 1.442695, %v629_v12 }
 0x46f   :  { %v2869_v15 = vpop.f32.mrf.mxu1 }
 0x470   :  { %3170 = vpow2.f32 %v630_v14 }
 0x47d   :  { %v3171_v16 = vpop.eup %3170 }
 0x47e   :  { %v632_v17 = vadd.f32 2.0, %v3171_v16 }
 0x480   :  { %v633_v18 = vmul.f32 %v3171_v16, %v632_v17 }
 0x482   :  { %v635_v26 = vadd.f32 2.0, %v633_v18  ;;  %v634_v29 = vmul.f32 %v633_v18, %v624_v10 }
 0x484   :  { %3172 = vrcp.f32 %v635_v26 }
 0x491   :  { %v3173_v30 = vpop.eup %3172 }
 0x492   :  { %v637_v31 = vmul.f32 %v3173_v30, %v634_v29 }
 0x494   :  { %v638_v32 = vpack.c.bf16 %v637_v31, %v637_v31 }
 0x496   :  { %2875 = vmatmul.mubr.msk.bf16.vlgmr.msra.gmra.mxu0 %vm142_vm1, %v638_v32 }
 0x497   :  { %2885 = vmatpush3.bf16.msra.mxu0 %v3374_v52  ;;  %2888 = vmatprep.mubr.msk.bf16.mxu0 %vm3333_vm3, %v3332_v35 }
 0x498   :  { %2886 = vmatprep.subr.bf16.mxu0 %v3332_v35 }
 0x49b   :  { %2887 = vmatpush3.bf16.msra.mxu0 %v3377_v55 }
 0x49c   :  { %2900 = vmatprep.subr.bf16.mxu0 %v3332_v35 }
 0x556   :  { %v676_v34 = vpop.f32.mrf.mxu0 }
 0x557   :  { %v677_v38 = vadd.f32 %v3437_v33, %v676_v34 }
 0x558   :  { %v2876_v40 = vpop.f32.mrf.mxu0 }
 0x559   :  { %v683_v41 = vmul.f32 0.32636425, %v677_v38 }
 0x55a   :  { %v679_v42 = vpop.f32.mrf.mxu0 }
 0x55b   :  { %v684_v43 = vsub.f32 %v682_v39, %v683_v41 }
 0x55c   :  { %v2877_v45 = vpop.f32.mrf.mxu0 }
 0x55d   :  { %v2645_v46 = vclamps-f32 %v684_v43, 1.0 }
 0x55f   :  { %v688_v50 = vmul.f32 0.19952175, %v2645_v46 }
 0x561   :  { %v690_v53 = vadd.f32 %v689_v49, %v688_v50 }
 0x563   :  { %v3442_v54 = vadd.f32 %v690_v53, %v687_v51 }
 0x565   :  { %v692_v56 = vpack.c.bf16 %v3442_v54, %v3442_v54 }
 0x567   :  { %2881 = vmatmul.mubr.msk.bf16.vlgmr.msra.gmra.mxu1 %vm475_vm4, %v692_v56 }
 0x568   :  { %2893 = vmatpush3.bf16.msra.mxu1 %v3403_v44  ;;  %2896 = vmatprep.mubr.msk.bf16.mxu1 %vm3333_vm3, %v3332_v35 }
 0x569   :  { %2894 = vmatprep.subr.bf16.mxu1 %v3332_v35 }
 0x56c   :  { %2895 = vmatpush3.bf16.msra.mxu1 %v3407_v47 }
 0x56d   :  { %2908 = vmatprep.subr.bf16.mxu1 %v3332_v35 }
 0x627   :  { %v730_v37 = vpop.f32.mrf.mxu1 }
 0x628   :  { %v731_v57 = vadd.f32 %v730_v37, %v3382_v19 }
 0x629   :  { %v2882_v58 = vpop.f32.mrf.mxu1 }
 0x62a   :  { %v736_v59 = vmin.f32 %v731_v57, 20.0 }
 0x62b   :  { %v733_v60 = vpop.f32.mrf.mxu1 }
 0x62c   :  { %v737_v61 = vmul.f32 1.442695, %v736_v59  ;;  %v895_v60 = vmul.f32 1.0413373, %v3442_v54 }
 0x62d   :  { %v2883_v62 = vpop.f32.mrf.mxu1 }
 0x62e   :  { %3174 = vpow2.f32 %v737_v61 }
 0x63b   :  { %v3175_v63 = vpop.eup %3174 }
 0x63c   :  { %v739_v0 = vadd.f32 2.0, %v3175_v63 }
 0x63e   :  { %v740_v1 = vmul.f32 %v3175_v63, %v739_v0 }
 0x640   :  { %v742_v2 = vadd.f32 2.0, %v740_v1  ;;  %v741_v3 = vmul.f32 %v740_v1, %v731_v57 }
 0x642   :  { %3176 = vrcp.f32 %v742_v2 }
 0x64f   :  { %v3177_v5 = vpop.eup %3176 }
 0x650   :  { %v744_v6 = vmul.f32 %v3177_v5, %v741_v3  ;;  %v902_v3 = vmul.f32 0.778355, %v3442_v54  ;;  %v900_v5 = vld [vmem:[#allocation2 + $0x110] sm:$0x3] }
 0x652   :  { %v745_v9 = vpack.c.bf16 %v744_v6, %v744_v6 }
 0x654   :  { %2889 = vmatmul.mubr.msk.bf16.vlgmr.msra.gmra.mxu0 %vm142_vm1, %v745_v9 }
 0x655   :  { %2901 = vmatpush3.bf16.msra.mxu0 %v3419_v4  ;;  %2904 = vmatprep.mubr.msk.bf16.mxu0 %vm3333_vm3, %v3332_v35 }
 0x656   :  { %2902 = vmatprep.subr.bf16.mxu0 %v3332_v35 }
 0x659   :  { %2903 = vmatpush3.bf16.msra.mxu0 %v3423_v7 }
 0x65a   :  { %2914 = vmatprep.subr.bf16.mxu0 %v3332_v35 }
 0x714   :  { %v783_v19 = vpop.f32.mrf.mxu0 }
 0x715   :  { %v784_v10 = vadd.f32 %v3411_v48, %v783_v19 }
 0x716   :  { %v2890_v11 = vpop.f32.mrf.mxu0 }
 0x717   :  { %v789_v12 = vmin.f32 %v784_v10, 20.0 }
 0x718   :  { %v786_v13 = vpop.f32.mrf.mxu0 }
 0x719   :  { %v790_v14 = vmul.f32 1.442695, %v789_v12 }
 0x71a   :  { %v2891_v15 = vpop.f32.mrf.mxu0 }
 0x71b   :  { %3178 = vpow2.f32 %v790_v14 }
 0x728   :  { %v3179_v16 = vpop.eup %3178 }
 0x729   :  { %v792_v17 = vadd.f32 2.0, %v3179_v16 }
 0x72b   :  { %v793_v18 = vmul.f32 %v3179_v16, %v792_v17 }
 0x72d   :  { %v795_v26 = vadd.f32 2.0, %v793_v18  ;;  %v794_v29 = vmul.f32 %v793_v18, %v784_v10 }
 0x72f   :  { %3180 = vrcp.f32 %v795_v26 }
 0x73c   :  { %v3181_v30 = vpop.eup %3180 }
 0x73d   :  { %v797_v31 = vmul.f32 %v3181_v30, %v794_v29 }
 0x73f   :  { %v798_v32 = vpack.c.bf16 %v797_v31, %v797_v31 }
 0x741   :  { %2897 = vmatmul.mubr.msk.bf16.vlgmr.msra.gmra.mxu1 %vm142_vm1, %v798_v32 }
 0x742   :  { %2909 = vmatpush3.bf16.msra.mxu1 %v3353_v36  ;;  %2910 = vmatprep.mubr.msk.bf16.mxu1 %vm3333_vm3, %v3332_v35 }
 0x743   :  { %2922 = vmatprep.subr.bf16.mxu1 %v3332_v35 }
 0x801   :  { %v836_v34 = vpop.f32.mrf.mxu1 }
 0x802   :  { %v837_v38 = vadd.f32 %v3427_v8, %v836_v34 }
 0x803   :  { %v2898_v39 = vpop.f32.mrf.mxu1 }
 0x804   :  { %v842_v40 = vmin.f32 %v837_v38, 20.0 }
 0x805   :  { %v839_v41 = vpop.f32.mrf.mxu1 }
 0x806   :  { %v843_v42 = vmul.f32 1.442695, %v842_v40 }
 0x807   :  { %v2899_v43 = vpop.f32.mrf.mxu1 }
 0x808   :  { %3182 = vpow2.f32 %v843_v42 }
 0x815   :  { %v3183_v45 = vpop.eup %3182 }
 0x816   :  { %v845_v46 = vadd.f32 2.0, %v3183_v45 }
 0x818   :  { %v846_v49 = vmul.f32 %v3183_v45, %v845_v46 }
 0x81a   :  { %v848_v50 = vadd.f32 2.0, %v846_v49  ;;  %v847_v51 = vmul.f32 %v846_v49, %v837_v38 }
 0x81c   :  { %3184 = vrcp.f32 %v848_v50 }
 0x829   :  { %v3185_v53 = vpop.eup %3184 }
 0x82a   :  { %v850_v56 = vmul.f32 %v3185_v53, %v847_v51 }
 0x82c   :  { %v851_v37 = vpack.c.bf16 %v850_v56, %v850_v56 }
 0x82e   :  { %2905 = vmatmul.mubr.msk.bf16.vlgmr.msra.gmra.mxu0 %vm142_vm1, %v851_v37 }
 0x82f   :  { %2915 = vmatpush3.bf16.msra.mxu0 %v3374_v52  ;;  %2918 = vmatprep.mubr.msk.bf16.mxu0 %vm3333_vm3, %v3332_v35 }
 0x830   :  { %2916 = vmatprep.subr.bf16.mxu0 %v3332_v35 }
 0x833   :  { %2917 = vmatpush3.bf16.msra.mxu0 %v3377_v55 }
 0x834   :  { %2930 = vmatprep.subr.bf16.mxu0 %v3332_v35 }
 0x8ee   :  { %v889_v57 = vpop.f32.mrf.mxu0 }
 0x8ef   :  { %v890_v58 = vadd.f32 %v3437_v33, %v889_v57 }
 0x8f0   :  { %v2906_v59 = vpop.f32.mrf.mxu0 }
 0x8f1   :  { %v896_v61 = vmul.f32 0.29048815, %v890_v58 }
 0x8f2   :  { %v892_v62 = vpop.f32.mrf.mxu0 }
 0x8f3   :  { %v897_v63 = vsub.f32 %v895_v60, %v896_v61 }
 0x8f4   :  { %v2907_v0 = vpop.f32.mrf.mxu0 }
 0x8f5   :  { %v2650_v1 = vclamps-f32 %v897_v63, 1.0 }
 0x8f7   :  { %v901_v2 = vmul.f32 0.22150372, %v2650_v1 }
 0x8f9   :  { %v903_v6 = vadd.f32 %v902_v3, %v901_v2 }
 0x8fb   :  { %v3478_v9 = vadd.f32 %v903_v6, %v900_v5 }
 0x8fd   :  { %v905_v19 = vpack.c.bf16 %v3478_v9, %v3478_v9 }
 0x8ff   :  { %2911 = vmatmul.mubr.msk.bf16.vlgmr.msra.gmra.mxu1 %vm475_vm4, %v905_v19 }
 0x900   :  { %2923 = vmatpush3.bf16.msra.mxu1 %v3403_v44  ;;  %2926 = vmatprep.mubr.msk.bf16.mxu1 %vm3333_vm3, %v3332_v35 }
 0x901   :  { %2924 = vmatprep.subr.bf16.mxu1 %v3332_v35 }
 0x904   :  { %2925 = vmatpush3.bf16.msra.mxu1 %v3407_v47 }
 0x905   :  { %2938 = vmatprep.subr.bf16.mxu1 %v3332_v35 }
 0x9bf   :  { %v943_v54 = vpop.f32.mrf.mxu1 }
 0x9c0   :  { %v944_v10 = vadd.f32 %v943_v54, %v3384_v20 }
 0x9c1   :  { %v2912_v11 = vpop.f32.mrf.mxu1 }
 0x9c2   :  { %v949_v12 = vmin.f32 %v944_v10, 20.0 }
 0x9c3   :  { %v946_v13 = vpop.f32.mrf.mxu1 }
 0x9c4   :  { %v950_v14 = vmul.f32 1.442695, %v949_v12  ;;  %v1108_v12 = vmul.f32 1.0320337, %v3478_v9 }
 0x9c5   :  { %v2913_v15 = vpop.f32.mrf.mxu1 }
 0x9c6   :  { %3186 = vpow2.f32 %v950_v14 }
 0x9d3   :  { %v3187_v16 = vpop.eup %3186 }
 0x9d4   :  { %v952_v17 = vadd.f32 2.0, %v3187_v16 }
 0x9d6   :  { %v953_v18 = vmul.f32 %v3187_v16, %v952_v17 }
 0x9d8   :  { %v955_v26 = vadd.f32 2.0, %v953_v18  ;;  %v954_v29 = vmul.f32 %v953_v18, %v944_v10 }
 0x9da   :  { %3188 = vrcp.f32 %v955_v26  ;;  %v1115_v26 = vmul.f32 0.7509803, %v3478_v9 }
 0x9e7   :  { %v3189_v30 = vpop.eup %3188 }
 0x9e8   :  { %v957_v31 = vmul.f32 %v3189_v30, %v954_v29  ;;  %v1113_v29 = vld [vmem:[#allocation2 + $0x10e] sm:$0x3] }
 0x9ea   :  { %v958_v32 = vpack.c.bf16 %v957_v31, %v957_v31 }
 0x9ec   :  { %2919 = vmatmul.mubr.msk.bf16.vlgmr.msra.gmra.mxu0 %vm142_vm1, %v958_v32 }
 0x9ed   :  { %2931 = vmatpush3.bf16.msra.mxu0 %v3419_v4  ;;  %2934 = vmatprep.mubr.msk.bf16.mxu0 %vm3333_vm3, %v3332_v35 }
 0x9ee   :  { %2932 = vmatprep.subr.bf16.mxu0 %v3332_v35 }
 0x9f1   :  { %2933 = vmatpush3.bf16.msra.mxu0 %v3423_v7 }
 0x9f2   :  { %2944 = vmatprep.subr.bf16.mxu0 %v3332_v35 }
 0xaac   :  { %v996_v20 = vpop.f32.mrf.mxu0 }
 0xaad   :  { %v997_v34 = vadd.f32 %v3411_v48, %v996_v20 }
 0xaae   :  { %v2920_v38 = vpop.f32.mrf.mxu0 }
 0xaaf   :  { %v1002_v39 = vmin.f32 %v997_v34, 20.0 }
 0xab0   :  { %v999_v40 = vpop.f32.mrf.mxu0 }
 0xab1   :  { %v1003_v41 = vmul.f32 1.442695, %v1002_v39 }
 0xab2   :  { %v2921_v42 = vpop.f32.mrf.mxu0 }
 0xab3   :  { %3190 = vpow2.f32 %v1003_v41 }
 0xac0   :  { %v3191_v43 = vpop.eup %3190 }
 0xac1   :  { %v1005_v45 = vadd.f32 2.0, %v3191_v43 }
 0xac3   :  { %v1006_v46 = vmul.f32 %v3191_v43, %v1005_v45 }
 0xac5   :  { %v1008_v49 = vadd.f32 2.0, %v1006_v46  ;;  %v1007_v50 = vmul.f32 %v1006_v46, %v997_v34 }
 0xac7   :  { %3192 = vrcp.f32 %v1008_v49 }
 0xad4   :  { %v3193_v51 = vpop.eup %3192 }
 0xad5   :  { %v1010_v53 = vmul.f32 %v3193_v51, %v1007_v50 }
 0xad7   :  { %v1011_v56 = vpack.c.bf16 %v1010_v53, %v1010_v53 }
 0xad9   :  { %2927 = vmatmul.mubr.msk.bf16.vlgmr.msra.gmra.mxu1 %vm142_vm1, %v1011_v56 }
 0xada   :  { %2939 = vmatpush3.bf16.msra.mxu1 %v3353_v36  ;;  %2940 = vmatprep.mubr.msk.bf16.mxu1 %vm3333_vm3, %v3332_v35 }
 0xadb   :  { %2952 = vmatprep.subr.bf16.mxu1 %v3332_v35 }
 0xb99   :  { %v1049_v37 = vpop.f32.mrf.mxu1 }
 0xb9a   :  { %v1050_v57 = vadd.f32 %v3427_v8, %v1049_v37 }
 0xb9b   :  { %v2928_v58 = vpop.f32.mrf.mxu1 }
 0xb9c   :  { %v1055_v59 = vmin.f32 %v1050_v57, 20.0 }
 0xb9d   :  { %v1052_v60 = vpop.f32.mrf.mxu1 }
 0xb9e   :  { %v1056_v61 = vmul.f32 1.442695, %v1055_v59 }
 0xb9f   :  { %v2929_v62 = vpop.f32.mrf.mxu1 }
 0xba0   :  { %3194 = vpow2.f32 %v1056_v61 }
 0xbad   :  { %v3195_v63 = vpop.eup %3194 }
 0xbae   :  { %v1058_v0 = vadd.f32 2.0, %v3195_v63 }
 0xbb0   :  { %v1059_v1 = vmul.f32 %v3195_v63, %v1058_v0 }
 0xbb2   :  { %v1061_v2 = vadd.f32 2.0, %v1059_v1  ;;  %v1060_v3 = vmul.f32 %v1059_v1, %v1050_v57 }
 0xbb4   :  { %3196 = vrcp.f32 %v1061_v2 }
 0xbc1   :  { %v3197_v5 = vpop.eup %3196 }
 0xbc2   :  { %v1063_v6 = vmul.f32 %v3197_v5, %v1060_v3 }
 0xbc4   :  { %v1064_v19 = vpack.c.bf16 %v1063_v6, %v1063_v6 }
 0xbc6   :  { %2935 = vmatmul.mubr.msk.bf16.vlgmr.msra.gmra.mxu0 %vm142_vm1, %v1064_v19 }
 0xbc7   :  { %2945 = vmatpush3.bf16.msra.mxu0 %v3374_v52  ;;  %2948 = vmatprep.mubr.msk.bf16.mxu0 %vm3333_vm3, %v3332_v35 }
 0xbc8   :  { %2946 = vmatprep.subr.bf16.mxu0 %v3332_v35 }
 0xbcb   :  { %2947 = vmatpush3.bf16.msra.mxu0 %v3377_v55 }
 0xbcc   :  { %2960 = vmatprep.subr.bf16.mxu0 %v3332_v35 }
 0xc86   :  { %v1102_v54 = vpop.f32.mrf.mxu0 }
 0xc87   :  { %v1103_v10 = vadd.f32 %v3437_v33, %v1102_v54 }
 0xc88   :  { %v2936_v11 = vpop.f32.mrf.mxu0 }
 0xc89   :  { %v1109_v13 = vmul.f32 0.25513408, %v1103_v10 }
 0xc8a   :  { %v1105_v14 = vpop.f32.mrf.mxu0 }
 0xc8b   :  { %v1110_v15 = vsub.f32 %v1108_v12, %v1109_v13 }
 0xc8c   :  { %v2937_v16 = vpop.f32.mrf.mxu0 }
 0xc8d   :  { %v2655_v17 = vclamps-f32 %v1110_v15, 1.0 }
 0xc8f   :  { %v1114_v18 = vmul.f32 0.24892682, %v2655_v17 }
 0xc91   :  { %v1116_v30 = vadd.f32 %v1115_v26, %v1114_v18 }
 0xc93   :  { %v3514_v31 = vadd.f32 %v1116_v30, %v1113_v29 }
 0xc95   :  { %v1118_v32 = vpack.c.bf16 %v3514_v31, %v3514_v31 }
 0xc97   :  { %2941 = vmatmul.mubr.msk.bf16.vlgmr.msra.gmra.mxu1 %vm475_vm4, %v1118_v32 }
 0xc98   :  { %2953 = vmatpush3.bf16.msra.mxu1 %v3403_v44  ;;  %2956 = vmatprep.mubr.msk.bf16.mxu1 %vm3333_vm3, %v3332_v35 }
 0xc99   :  { %2954 = vmatprep.subr.bf16.mxu1 %v3332_v35 }
 0xc9c   :  { %2955 = vmatpush3.bf16.msra.mxu1 %v3407_v47 }
 0xc9d   :  { %2968 = vmatprep.subr.bf16.mxu1 %v3332_v35 }
 0xd57   :  { %v1156_v9 = vpop.f32.mrf.mxu1 }
 0xd58   :  { %v1157_v20 = vadd.f32 %v1156_v9, %v3386_v21 }
 0xd59   :  { %v2942_v34 = vpop.f32.mrf.mxu1 }
 0xd5a   :  { %v1162_v38 = vmin.f32 %v1157_v20, 20.0  ;;  %v1321_v34 = vmul.f32 1.0239637, %v3514_v31 }
 0xd5b   :  { %v1159_v39 = vpop.f32.mrf.mxu1 }
 0xd5c   :  { %v1163_v40 = vmul.f32 1.442695, %v1162_v38 }
 0xd5d   :  { %v2943_v41 = vpop.f32.mrf.mxu1 }
 0xd5e   :  { %3198 = vpow2.f32 %v1163_v40 }
 0xd6b   :  { %v3199_v42 = vpop.eup %3198 }
 0xd6c   :  { %v1165_v43 = vadd.f32 2.0, %v3199_v42 }
 0xd6e   :  { %v1166_v45 = vmul.f32 %v3199_v42, %v1165_v43 }
 0xd70   :  { %v1168_v46 = vadd.f32 2.0, %v1166_v45  ;;  %v1167_v49 = vmul.f32 %v1166_v45, %v1157_v20  ;;  %v1328_v45 = vmul.f32 0.71584207, %v3514_v31 }
 0xd72   :  { %3200 = vrcp.f32 %v1168_v46  ;;  %v1326_v46 = vld [vmem:[#allocation2 + $0x10c] sm:$0x3] }
 0xd7f   :  { %v3201_v50 = vpop.eup %3200 }
 0xd80   :  { %v1170_v51 = vmul.f32 %v3201_v50, %v1167_v49 }
 0xd82   :  { %v1171_v53 = vpack.c.bf16 %v1170_v51, %v1170_v51 }
 0xd84   :  { %2949 = vmatmul.mubr.msk.bf16.vlgmr.msra.gmra.mxu0 %vm142_vm1, %v1171_v53 }
 0xd85   :  { %2961 = vmatpush3.bf16.msra.mxu0 %v3419_v4  ;;  %2964 = vmatprep.mubr.msk.bf16.mxu0 %vm3333_vm3, %v3332_v35 }
 0xd86   :  { %2962 = vmatprep.subr.bf16.mxu0 %v3332_v35 }
 0xd89   :  { %2963 = vmatpush3.bf16.msra.mxu0 %v3423_v7 }
 0xd8a   :  { %2974 = vmatprep.subr.bf16.mxu0 %v3332_v35 }
 0xe44   :  { %v1209_v21 = vpop.f32.mrf.mxu0 }
 0xe45   :  { %v1210_v56 = vadd.f32 %v3411_v48, %v1209_v21 }
 0xe46   :  { %v2950_v37 = vpop.f32.mrf.mxu0 }
 0xe47   :  { %v1215_v57 = vmin.f32 %v1210_v56, 20.0 }
 0xe48   :  { %v1212_v58 = vpop.f32.mrf.mxu0 }
 0xe49   :  { %v1216_v59 = vmul.f32 1.442695, %v1215_v57 }
 0xe4a   :  { %v2951_v60 = vpop.f32.mrf.mxu0 }
 0xe4b   :  { %3202 = vpow2.f32 %v1216_v59 }
 0xe58   :  { %v3203_v61 = vpop.eup %3202 }
 0xe59   :  { %v1218_v62 = vadd.f32 2.0, %v3203_v61 }
 0xe5b   :  { %v1219_v63 = vmul.f32 %v3203_v61, %v1218_v62 }
 0xe5d   :  { %v1221_v0 = vadd.f32 2.0, %v1219_v63  ;;  %v1220_v1 = vmul.f32 %v1219_v63, %v1210_v56 }
 0xe5f   :  { %3204 = vrcp.f32 %v1221_v0 }
 0xe6c   :  { %v3205_v2 = vpop.eup %3204 }
 0xe6d   :  { %v1223_v3 = vmul.f32 %v3205_v2, %v1220_v1 }
 0xe6f   :  { %v1224_v5 = vpack.c.bf16 %v1223_v3, %v1223_v3 }
 0xe71   :  { %2957 = vmatmul.mubr.msk.bf16.vlgmr.msra.gmra.mxu1 %vm142_vm1, %v1224_v5 }
 0xe72   :  { %2969 = vmatpush3.bf16.msra.mxu1 %v3353_v36  ;;  %2970 = vmatprep.mubr.msk.bf16.mxu1 %vm3333_vm3, %v3332_v35 }
 0xe73   :  { %2982 = vmatprep.subr.bf16.mxu1 %v3332_v35 }
 0xf31   :  { %v1262_v6 = vpop.f32.mrf.mxu1 }
 0xf32   :  { %v1263_v19 = vadd.f32 %v3427_v8, %v1262_v6 }
 0xf33   :  { %v2958_v54 = vpop.f32.mrf.mxu1 }
 0xf34   :  { %v1268_v10 = vmin.f32 %v1263_v19, 20.0 }
 0xf35   :  { %v1265_v11 = vpop.f32.mrf.mxu1 }
 0xf36   :  { %v1269_v12 = vmul.f32 1.442695, %v1268_v10 }
 0xf37   :  { %v2959_v13 = vpop.f32.mrf.mxu1 }
 0xf38   :  { %3206 = vpow2.f32 %v1269_v12 }
 0xf45   :  { %v3207_v14 = vpop.eup %3206 }
 0xf46   :  { %v1271_v15 = vadd.f32 2.0, %v3207_v14 }
 0xf48   :  { %v1272_v16 = vmul.f32 %v3207_v14, %v1271_v15 }
 0xf4a   :  { %v1274_v17 = vadd.f32 2.0, %v1272_v16  ;;  %v1273_v18 = vmul.f32 %v1272_v16, %v1263_v19 }
 0xf4c   :  { %3208 = vrcp.f32 %v1274_v17 }
 0xf59   :  { %v3209_v26 = vpop.eup %3208 }
 0xf5a   :  { %v1276_v29 = vmul.f32 %v3209_v26, %v1273_v18 }
 0xf5c   :  { %v1277_v30 = vpack.c.bf16 %v1276_v29, %v1276_v29 }
 0xf5e   :  { %2965 = vmatmul.mubr.msk.bf16.vlgmr.msra.gmra.mxu0 %vm142_vm1, %v1277_v30 }
 0xf5f   :  { %2975 = vmatpush3.bf16.msra.mxu0 %v3374_v52  ;;  %2978 = vmatprep.mubr.msk.bf16.mxu0 %vm3333_vm3, %v3332_v35 }
 0xf60   :  { %2976 = vmatprep.subr.bf16.mxu0 %v3332_v35 }
 0xf63   :  { %2977 = vmatpush3.bf16.msra.mxu0 %v3377_v55 }
 0xf64   :  { %2990 = vmatprep.subr.bf16.mxu0 %v3332_v35 }
0x101e   :  { %v1315_v32 = vpop.f32.mrf.mxu0 }
0x101f   :  { %v1316_v9 = vadd.f32 %v3437_v33, %v1315_v32 }
0x1020   :  { %v2966_v20 = vpop.f32.mrf.mxu0 }
0x1021   :  { %v1322_v38 = vmul.f32 0.22023082, %v1316_v9 }
0x1022   :  { %v1318_v39 = vpop.f32.mrf.mxu0 }
0x1023   :  { %v1323_v40 = vsub.f32 %v1321_v34, %v1322_v38 }
0x1024   :  { %v2967_v41 = vpop.f32.mrf.mxu0 }
0x1025   :  { %v2660_v42 = vclamps-f32 %v1323_v40, 1.0 }
0x1027   :  { %v1327_v43 = vmul.f32 0.2841015, %v2660_v42 }
0x1029   :  { %v1329_v49 = vadd.f32 %v1328_v45, %v1327_v43 }
0x102b   :  { %v3550_v50 = vadd.f32 %v1329_v49, %v1326_v46 }
0x102d   :  { %v1331_v51 = vpack.c.bf16 %v3550_v50, %v3550_v50 }
0x102f   :  { %2971 = vmatmul.mubr.msk.bf16.vlgmr.msra.gmra.mxu1 %vm475_vm4, %v1331_v51 }
0x1030   :  { %2983 = vmatpush3.bf16.msra.mxu1 %v3403_v44  ;;  %2986 = vmatprep.mubr.msk.bf16.mxu1 %vm3333_vm3, %v3332_v35 }
0x1031   :  { %2984 = vmatprep.subr.bf16.mxu1 %v3332_v35 }
0x1034   :  { %2985 = vmatpush3.bf16.msra.mxu1 %v3407_v47 }
0x1035   :  { %2998 = vmatprep.subr.bf16.mxu1 %v3332_v35 }
0x10ef   :  { %v1369_v31 = vpop.f32.mrf.mxu1 }
0x10f0   :  { %v1370_v53 = vadd.f32 %v1369_v31, %v3388_v22 }
0x10f1   :  { %v2972_v21 = vpop.f32.mrf.mxu1 }
0x10f2   :  { %v1375_v56 = vmin.f32 %v1370_v53, 20.0 }
0x10f3   :  { %v1372_v37 = vpop.f32.mrf.mxu1 }
0x10f4   :  { %v1376_v57 = vmul.f32 1.442695, %v1375_v56 }
0x10f5   :  { %v2973_v58 = vpop.f32.mrf.mxu1 }
0x10f6   :  { %3210 = vpow2.f32 %v1376_v57 }
0x1103   :  { %v3211_v59 = vpop.eup %3210 }
0x1104   :  { %v1378_v60 = vadd.f32 2.0, %v3211_v59 }
0x1106   :  { %v1379_v61 = vmul.f32 %v3211_v59, %v1378_v60  ;;  %v1541_v60 = vmul.f32 0.6691125, %v3550_v50 }
0x1108   :  { %v1381_v62 = vadd.f32 2.0, %v1379_v61  ;;  %v1380_v63 = vmul.f32 %v1379_v61, %v1370_v53  ;;  %v1534_v53 = vmul.f32 1.0170971, %v3550_v50  ;;  %v1539_v61 = vld [vmem:[#allocation2 + $0x10a] sm:$0x3] }
0x110a   :  { %3212 = vrcp.f32 %v1381_v62 }
0x1117   :  { %v3213_v0 = vpop.eup %3212 }
0x1118   :  { %v1383_v1 = vmul.f32 %v3213_v0, %v1380_v63 }
0x111a   :  { %v1384_v2 = vpack.c.bf16 %v1383_v1, %v1383_v1 }
0x111c   :  { %2979 = vmatmul.mubr.msk.bf16.vlgmr.msra.gmra.mxu0 %vm142_vm1, %v1384_v2 }
0x111d   :  { %2991 = vmatpush3.bf16.msra.mxu0 %v3419_v4  ;;  %2994 = vmatprep.mubr.msk.bf16.mxu0 %vm3333_vm3, %v3332_v35 }
0x111e   :  { %2992 = vmatprep.subr.bf16.mxu0 %v3332_v35 }
0x1121   :  { %2993 = vmatpush3.bf16.msra.mxu0 %v3423_v7 }
0x1122   :  { %3004 = vmatprep.subr.bf16.mxu0 %v3332_v35 }
0x11dc   :  { %v1422_v22 = vpop.f32.mrf.mxu0 }
0x11dd   :  { %v1423_v3 = vadd.f32 %v3411_v48, %v1422_v22 }
0x11de   :  { %v2980_v5 = vpop.f32.mrf.mxu0 }
0x11df   :  { %v1428_v6 = vmin.f32 %v1423_v3, 20.0 }
0x11e0   :  { %v1425_v19 = vpop.f32.mrf.mxu0 }
0x11e1   :  { %v1429_v54 = vmul.f32 1.442695, %v1428_v6 }
0x11e2   :  { %v2981_v10 = vpop.f32.mrf.mxu0 }
0x11e3   :  { %3214 = vpow2.f32 %v1429_v54 }
0x11f0   :  { %v3215_v11 = vpop.eup %3214 }
0x11f1   :  { %v1431_v12 = vadd.f32 2.0, %v3215_v11 }
0x11f3   :  { %v1432_v13 = vmul.f32 %v3215_v11, %v1431_v12 }
0x11f5   :  { %v1434_v14 = vadd.f32 2.0, %v1432_v13  ;;  %v1433_v15 = vmul.f32 %v1432_v13, %v1423_v3 }
0x11f7   :  { %3216 = vrcp.f32 %v1434_v14 }
0x1204   :  { %v3217_v16 = vpop.eup %3216 }
0x1205   :  { %v1436_v17 = vmul.f32 %v3217_v16, %v1433_v15 }
0x1207   :  { %v1437_v18 = vpack.c.bf16 %v1436_v17, %v1436_v17 }
0x1209   :  { %2987 = vmatmul.mubr.msk.bf16.vlgmr.msra.gmra.mxu1 %vm142_vm1, %v1437_v18 }
0x120a   :  { %2999 = vmatpush3.bf16.msra.mxu1 %v3353_v36  ;;  %3000 = vmatprep.mubr.msk.bf16.mxu1 %vm3333_vm3, %v3332_v35 }
0x120b   :  { %3012 = vmatprep.subr.bf16.mxu1 %v3332_v35 }
0x12c9   :  { %v1475_v26 = vpop.f32.mrf.mxu1 }
0x12ca   :  { %v1476_v29 = vadd.f32 %v3427_v8, %v1475_v26 }
0x12cb   :  { %v2988_v30 = vpop.f32.mrf.mxu1 }
0x12cc   :  { %v1481_v32 = vmin.f32 %v1476_v29, 20.0 }
0x12cd   :  { %v1478_v9 = vpop.f32.mrf.mxu1 }
0x12ce   :  { %v1482_v20 = vmul.f32 1.442695, %v1481_v32 }
0x12cf   :  { %v2989_v34 = vpop.f32.mrf.mxu1 }
0x12d0   :  { %3218 = vpow2.f32 %v1482_v20 }
0x12dd   :  { %v3219_v38 = vpop.eup %3218 }
0x12de   :  { %v1484_v39 = vadd.f32 2.0, %v3219_v38 }
0x12e0   :  { %v1485_v40 = vmul.f32 %v3219_v38, %v1484_v39 }
0x12e2   :  { %v1487_v41 = vadd.f32 2.0, %v1485_v40  ;;  %v1486_v42 = vmul.f32 %v1485_v40, %v1476_v29 }
0x12e4   :  { %3220 = vrcp.f32 %v1487_v41 }
0x12f1   :  { %v3221_v43 = vpop.eup %3220 }
0x12f2   :  { %v1489_v45 = vmul.f32 %v3221_v43, %v1486_v42 }
0x12f4   :  { %v1490_v46 = vpack.c.bf16 %v1489_v45, %v1489_v45 }
0x12f6   :  { %2995 = vmatmul.mubr.msk.bf16.vlgmr.msra.gmra.mxu0 %vm142_vm1, %v1490_v46 }
0x12f7   :  { %3005 = vmatpush3.bf16.msra.mxu0 %v3374_v52  ;;  %3008 = vmatprep.mubr.msk.bf16.mxu0 %vm3333_vm3, %v3332_v35 }
0x12f8   :  { %3006 = vmatprep.subr.bf16.mxu0 %v3332_v35 }
0x12fb   :  { %3007 = vmatpush3.bf16.msra.mxu0 %v3377_v55 }
0x12fc   :  { %3020 = vmatprep.subr.bf16.mxu0 %v3332_v35 }
0x13b6   :  { %v1528_v49 = vpop.f32.mrf.mxu0 }
0x13b7   :  { %v1529_v51 = vadd.f32 %v3437_v33, %v1528_v49 }
0x13b8   :  { %v2996_v31 = vpop.f32.mrf.mxu0 }
0x13b9   :  { %v1535_v21 = vmul.f32 0.18570583, %v1529_v51 }
0x13ba   :  { %v1531_v56 = vpop.f32.mrf.mxu0 }
0x13bb   :  { %v1536_v37 = vsub.f32 %v1534_v53, %v1535_v21 }
0x13bc   :  { %v2997_v57 = vpop.f32.mrf.mxu0 }
0x13bd   :  { %v2665_v58 = vclamps-f32 %v1536_v37, 1.0 }
0x13bf   :  { %v1540_v59 = vmul.f32 0.33085543, %v2665_v58 }
0x13c1   :  { %v1542_v62 = vadd.f32 %v1541_v60, %v1540_v59 }
0x13c3   :  { %v3586_v63 = vadd.f32 %v1542_v62, %v1539_v61 }
0x13c5   :  { %v1544_v0 = vpack.c.bf16 %v3586_v63, %v3586_v63  ;;  %v1747_v62 = vmul.f32 1.0114081, %v3586_v63 }
0x13c7   :  { %3001 = vmatmul.mubr.msk.bf16.vlgmr.msra.gmra.mxu1 %vm475_vm4, %v1544_v0 }
0x13c8   :  { %3013 = vmatpush3.bf16.msra.mxu1 %v3403_v44  ;;  %3016 = vmatprep.mubr.msk.bf16.mxu1 %vm3333_vm3, %v3332_v35 }
0x13c9   :  { %3014 = vmatprep.subr.bf16.mxu1 %v3332_v35 }
0x13cc   :  { %3015 = vmatpush3.bf16.msra.mxu1 %v3407_v47 }
0x13cd   :  { %3028 = vmatprep.subr.bf16.mxu1 %v3332_v35 }
0x1487   :  { %v1582_v50 = vpop.f32.mrf.mxu1 }
0x1488   :  { %v1583_v1 = vadd.f32 %v1582_v50, %v3390_v23 }
0x1489   :  { %v3002_v2 = vpop.f32.mrf.mxu1 }
0x148a   :  { %v1588_v22 = vmin.f32 %v1583_v1, 20.0 }
0x148b   :  { %v1585_v3 = vpop.f32.mrf.mxu1 }
0x148c   :  { %v1589_v5 = vmul.f32 1.442695, %v1588_v22 }
0x148d   :  { %v3003_v6 = vpop.f32.mrf.mxu1 }
0x148e   :  { %3222 = vpow2.f32 %v1589_v5  ;;  %v1754_v5 = vmul.f32 0.6039645, %v3586_v63  ;;  %v1752_v6 = vld [vmem:[#allocation2 + $0x108] sm:$0x3] }
0x149b   :  { %v3223_v19 = vpop.eup %3222 }
0x149c   :  { %v1591_v54 = vadd.f32 2.0, %v3223_v19 }
0x149e   :  { %v1592_v10 = vmul.f32 %v3223_v19, %v1591_v54 }
0x14a0   :  { %v1594_v11 = vadd.f32 2.0, %v1592_v10  ;;  %v1593_v12 = vmul.f32 %v1592_v10, %v1583_v1 }
0x14a2   :  { %3224 = vrcp.f32 %v1594_v11 }
0x14af   :  { %v3225_v13 = vpop.eup %3224 }
0x14b0   :  { %v1596_v14 = vmul.f32 %v3225_v13, %v1593_v12 }
0x14b2   :  { %v1597_v15 = vpack.c.bf16 %v1596_v14, %v1596_v14 }
0x14b4   :  { %3009 = vmatmul.mubr.msk.bf16.vlgmr.msra.gmra.mxu0 %vm142_vm1, %v1597_v15 }
0x14b5   :  { %3021 = vmatpush3.bf16.msra.mxu0 %v3419_v4  ;;  %3024 = vmatprep.mubr.msk.bf16.mxu0 %vm3333_vm3, %v3332_v35 }
0x14b6   :  { %3022 = vmatprep.subr.bf16.mxu0 %v3332_v35 }
0x14b9   :  { %3023 = vmatpush3.bf16.msra.mxu0 %v3423_v7 }
0x14ba   :  { %3034 = vmatprep.subr.bf16.mxu0 %v3332_v35 }
0x1574   :  { %v1635_v23 = vpop.f32.mrf.mxu0 }
0x1575   :  { %v1636_v16 = vadd.f32 %v3411_v48, %v1635_v23 }
0x1576   :  { %v3010_v17 = vpop.f32.mrf.mxu0 }
0x1577   :  { %v1641_v18 = vmin.f32 %v1636_v16, 20.0 }
0x1578   :  { %v1638_v26 = vpop.f32.mrf.mxu0 }
0x1579   :  { %v1642_v29 = vmul.f32 1.442695, %v1641_v18 }
0x157a   :  { %v3011_v30 = vpop.f32.mrf.mxu0 }
0x157b   :  { %3226 = vpow2.f32 %v1642_v29 }
0x1588   :  { %v3227_v32 = vpop.eup %3226 }
0x1589   :  { %v1644_v9 = vadd.f32 2.0, %v3227_v32 }
0x158b   :  { %v1645_v20 = vmul.f32 %v3227_v32, %v1644_v9  ;;  %v3641_v9 = vld [vmem:[#allocation2 + $0x88] ss:$0 sm:$0xff] }
0x158d   :  { %v1647_v34 = vadd.f32 2.0, %v1645_v20  ;;  %v1646_v38 = vmul.f32 %v1645_v20, %v1636_v16 }
0x158f   :  { %3228 = vrcp.f32 %v1647_v34 }
0x159c   :  { %v3229_v39 = vpop.eup %3228 }
0x159d   :  { %v1649_v40 = vmul.f32 %v3229_v39, %v1646_v38 }
0x159f   :  { %v1650_v41 = vpack.c.bf16 %v1649_v40, %v1649_v40 }
0x15a1   :  { %3017 = vmatmul.mubr.msk.bf16.vlgmr.msra.gmra.mxu1 %vm142_vm1, %v1650_v41 }
0x15a2   :  { %3029 = vmatpush3.bf16.msra.mxu1 %v3353_v36  ;;  %3030 = vmatprep.mubr.msk.bf16.mxu1 %vm3333_vm3, %v3332_v35 }
0x15a3   :  { %3042 = vmatprep.subr.bf16.mxu1 %v3332_v35 }
0x1661   :  { %v1688_v48 = vpop.f32.mrf.mxu1 }
0x1662   :  { %v1689_v42 = vadd.f32 %v3427_v8, %v1688_v48 }
0x1663   :  { %v3018_v43 = vpop.f32.mrf.mxu1 }
0x1664   :  { %v1694_v45 = vmin.f32 %v1689_v42, 20.0 }
0x1665   :  { %v1691_v46 = vpop.f32.mrf.mxu1 }
0x1666   :  { %v1695_v49 = vmul.f32 1.442695, %v1694_v45 }
0x1667   :  { %v3019_v51 = vpop.f32.mrf.mxu1 }
0x1668   :  { %3230 = vpow2.f32 %v1695_v49 }
0x1675   :  { %v3231_v31 = vpop.eup %3230 }
0x1676   :  { %v1697_v53 = vadd.f32 2.0, %v3231_v31 }
0x1678   :  { %v1698_v21 = vmul.f32 %v3231_v31, %v1697_v53 }
0x167a   :  { %v1700_v56 = vadd.f32 2.0, %v1698_v21  ;;  %v1699_v37 = vmul.f32 %v1698_v21, %v1689_v42  ;;  %v3649_v21 = vld [vmem:[#allocation2 + $0xb0] ss:$0 sm:$0xff] }
0x167c   :  { %3232 = vrcp.f32 %v1700_v56 }
0x1689   :  { %v3233_v57 = vpop.eup %3232 }
0x168a   :  { %v1702_v58 = vmul.f32 %v3233_v57, %v1699_v37 }
0x168c   :  { %v1703_v59 = vpack.c.bf16 %v1702_v58, %v1702_v58 }
0x168e   :  { %3025 = vmatmul.mubr.msk.bf16.vlgmr.msra.gmra.mxu0 %vm142_vm1, %v1703_v59 }
0x168f   :  { %3035 = vmatpush3.bf16.msra.mxu0 %v3374_v52  ;;  %3038 = vmatprep.mubr.msk.bf16.mxu0 %vm3333_vm3, %v3332_v35 }
0x1690   :  { %3036 = vmatprep.subr.bf16.mxu0 %v3332_v35 }
0x1693   :  { %3037 = vmatpush3.bf16.msra.mxu0 %v3377_v55 }
0x1694   :  { %3050 = vmatprep.subr.bf16.mxu0 %v3332_v35 }
0x174e   :  { %v1741_v8 = vpop.f32.mrf.mxu0 }
0x174f   :  { %v1742_v60 = vadd.f32 %v3437_v33, %v1741_v8 }
0x1750   :  { %v3026_v61 = vpop.f32.mrf.mxu0 }
0x1751   :  { %v1748_v0 = vmul.f32 0.15148056, %v1742_v60 }
0x1752   :  { %v1744_v50 = vpop.f32.mrf.mxu0 }
0x1753   :  { %v1749_v1 = vsub.f32 %v1747_v62, %v1748_v0 }
0x1754   :  { %v3027_v2 = vpop.f32.mrf.mxu0 }
0x1755   :  { %v2670_v22 = vclamps-f32 %v1749_v1, 1.0 }
0x1757   :  { %v1753_v3 = vmul.f32 0.39601925, %v2670_v22 }
0x1759   :  { %v1755_v19 = vadd.f32 %v1754_v5, %v1753_v3  ;;  %v3659_v5 = vld [vmem:[#allocation2 + $0xd8] ss:$0 sm:$0xff] }
0x175b   :  { %v3622_v54 = vadd.f32 %v1755_v19, %v1752_v6 }
0x175d   :  { %v1757_v10 = vpack.c.bf16 %v3622_v54, %v3622_v54 }
0x175f   :  { %3031 = vmatmul.mubr.msk.bf16.vlgmr.msra.gmra.mxu1 %vm475_vm4, %v1757_v10  ;;  %v1960_v10 = vmul.f32 1.0068747, %v3622_v54 }
0x1760   :  { %3043 = vmatpush3.bf16.msra.mxu1 %v3403_v44  ;;  %3046 = vmatprep.mubr.msk.bf16.mxu1 %vm3333_vm3, %v3332_v35 }
0x1761   :  { %3044 = vmatprep.subr.bf16.mxu1 %v3332_v35 }
0x1764   :  { %3045 = vmatpush3.bf16.msra.mxu1 %v3407_v47 }
0x1765   :  { %3058 = vmatprep.subr.bf16.mxu1 %v3332_v35 }
0x181f   :  { %v1795_v33 = vpop.f32.mrf.mxu1 }
0x1820   :  { %v1796_v63 = vadd.f32 %v1795_v33, %v3392_v24 }
0x1821   :  { %v3032_v11 = vpop.f32.mrf.mxu1 }
0x1822   :  { %v1801_v12 = vmin.f32 %v1796_v63, 20.0 }
0x1823   :  { %v1798_v13 = vpop.f32.mrf.mxu1 }
0x1824   :  { %v1802_v14 = vmul.f32 1.442695, %v1801_v12 }
0x1825   :  { %v3033_v15 = vpop.f32.mrf.mxu1 }
0x1826   :  { %3234 = vpow2.f32 %v1802_v14  ;;  %v1967_v15 = vmul.f32 0.50693476, %v3622_v54 }
0x1833   :  { %v3235_v23 = vpop.eup %3234 }
0x1834   :  { %v1804_v16 = vadd.f32 2.0, %v3235_v23 }
0x1836   :  { %v1805_v17 = vmul.f32 %v3235_v23, %v1804_v16  ;;  %v1965_v23 = vld [vmem:[#allocation2 + $0x106] sm:$0x3] }
0x1838   :  { %v1807_v18 = vadd.f32 2.0, %v1805_v17  ;;  %v1806_v26 = vmul.f32 %v1805_v17, %v1796_v63 }
0x183a   :  { %3236 = vrcp.f32 %v1807_v18 }
0x1847   :  { %v3237_v29 = vpop.eup %3236 }
0x1848   :  { %v1809_v30 = vmul.f32 %v3237_v29, %v1806_v26 }
0x184a   :  { %v1810_v32 = vpack.c.bf16 %v1809_v30, %v1809_v30 }
0x184c   :  { %3039 = vmatmul.mubr.msk.bf16.vlgmr.msra.gmra.mxu0 %vm142_vm1, %v1810_v32 }
0x184d   :  { %3051 = vmatpush3.bf16.msra.mxu0 %v3419_v4  ;;  %3054 = vmatprep.mubr.msk.bf16.mxu0 %vm3333_vm3, %v3332_v35 }
0x184e   :  { %3052 = vmatprep.subr.bf16.mxu0 %v3332_v35 }
0x1851   :  { %3053 = vmatpush3.bf16.msra.mxu0 %v3423_v7 }
0x1852   :  { %3064 = vmatprep.subr.bf16.mxu0 %v3332_v35 }
0x190c   :  { %v1848_v24 = vpop.f32.mrf.mxu0 }
0x190d   :  { %v1849_v20 = vadd.f32 %v3641_v9, %v1848_v24 }
0x190e   :  { %v3040_v34 = vpop.f32.mrf.mxu0 }
0x190f   :  { %v1854_v38 = vmin.f32 %v1849_v20, 20.0 }
0x1910   :  { %v1851_v39 = vpop.f32.mrf.mxu0 }
0x1911   :  { %v1855_v40 = vmul.f32 1.442695, %v1854_v38 }
0x1912   :  { %v3041_v41 = vpop.f32.mrf.mxu0 }
0x1913   :  { %3238 = vpow2.f32 %v1855_v40 }
0x1920   :  { %v3239_v48 = vpop.eup %3238 }
0x1921   :  { %v1857_v42 = vadd.f32 2.0, %v3239_v48 }
0x1923   :  { %v1858_v43 = vmul.f32 %v3239_v48, %v1857_v42 }
0x1925   :  { %v1860_v45 = vadd.f32 2.0, %v1858_v43  ;;  %v1859_v46 = vmul.f32 %v1858_v43, %v1849_v20 }
0x1927   :  { %3240 = vrcp.f32 %v1860_v45 }
0x1934   :  { %v3241_v49 = vpop.eup %3240 }
0x1935   :  { %v1862_v51 = vmul.f32 %v3241_v49, %v1859_v46 }
0x1937   :  { %v1863_v31 = vpack.c.bf16 %v1862_v51, %v1862_v51 }
0x1939   :  { %3047 = vmatmul.mubr.msk.bf16.vlgmr.msra.gmra.mxu1 %vm142_vm1, %v1863_v31 }
0x193a   :  { %3059 = vmatpush3.bf16.msra.mxu1 %v3353_v36  ;;  %3060 = vmatprep.mubr.msk.bf16.mxu1 %vm3333_vm3, %v3332_v35 }
0x193b   :  { %3072 = vmatprep.subr.bf16.mxu1 %v3332_v35 }
0x19f9   :  { %v1901_v53 = vpop.f32.mrf.mxu1 }
0x19fa   :  { %v1902_v56 = vadd.f32 %v3649_v21, %v1901_v53 }
0x19fb   :  { %v3048_v37 = vpop.f32.mrf.mxu1 }
0x19fc   :  { %v1907_v57 = vmin.f32 %v1902_v56, 20.0 }
0x19fd   :  { %v1904_v58 = vpop.f32.mrf.mxu1 }
0x19fe   :  { %v1908_v59 = vmul.f32 1.442695, %v1907_v57 }
0x19ff   :  { %v3049_v8 = vpop.f32.mrf.mxu1 }
0x1a00   :  { %3242 = vpow2.f32 %v1908_v59 }
0x1a0d   :  { %v3243_v60 = vpop.eup %3242 }
0x1a0e   :  { %v1910_v61 = vadd.f32 2.0, %v3243_v60 }
0x1a10   :  { %v1911_v62 = vmul.f32 %v3243_v60, %v1910_v61 }
0x1a12   :  { %v1913_v0 = vadd.f32 2.0, %v1911_v62  ;;  %v1912_v50 = vmul.f32 %v1911_v62, %v1902_v56 }
0x1a14   :  { %3244 = vrcp.f32 %v1913_v0 }
0x1a21   :  { %v3245_v1 = vpop.eup %3244 }
0x1a22   :  { %v1915_v2 = vmul.f32 %v3245_v1, %v1912_v50 }
0x1a24   :  { %v1916_v22 = vpack.c.bf16 %v1915_v2, %v1915_v2 }
0x1a26   :  { %3055 = vmatmul.mubr.msk.bf16.vlgmr.msra.gmra.mxu0 %vm142_vm1, %v1916_v22 }
0x1a27   :  { %3065 = vmatpush3.bf16.msra.mxu0 %v3374_v52  ;;  %3068 = vmatprep.mubr.msk.bf16.mxu0 %vm3333_vm3, %v3332_v35 }
0x1a28   :  { %3066 = vmatprep.subr.bf16.mxu0 %v3332_v35 }
0x1a2b   :  { %3067 = vmatpush3.bf16.msra.mxu0 %v3377_v55 }
0x1a2c   :  { %3080 = vmatprep.subr.bf16.mxu0 %v3332_v35 }
0x1ae6   :  { %v1954_v3 = vpop.f32.mrf.mxu0 }
0x1ae7   :  { %v1955_v6 = vadd.f32 %v3659_v5, %v1954_v3 }
0x1ae8   :  { %v3056_v19 = vpop.f32.mrf.mxu0 }
0x1ae9   :  { %v1961_v33 = vmul.f32 0.1174593, %v1955_v6 }
0x1aea   :  { %v1957_v63 = vpop.f32.mrf.mxu0 }
0x1aeb   :  { %v1962_v11 = vsub.f32 %v1960_v10, %v1961_v33 }
0x1aec   :  { %v3057_v12 = vpop.f32.mrf.mxu0 }
0x1aed   :  { %v2675_v13 = vclamps-f32 %v1962_v11, 1.0 }
0x1aef   :  { %v1966_v14 = vmul.f32 0.49305764, %v2675_v13 }
0x1af1   :  { %v1968_v16 = vadd.f32 %v1967_v15, %v1966_v14 }
0x1af3   :  { %v3664_v17 = vadd.f32 %v1968_v16, %v1965_v23 }
0x1af5   :  { %v1970_v18 = vpack.c.bf16 %v3664_v17, %v3664_v17  ;;  %v2173_v16 = vmul.f32 1.0034791, %v3664_v17 }
0x1af7   :  { %3061 = vmatmul.mubr.msk.bf16.vlgmr.msra.gmra.mxu1 %vm475_vm4, %v1970_v18 }
0x1af8   :  { %3073 = vmatpush3.bf16.msra.mxu1 %v3403_v44  ;;  %3076 = vmatprep.mubr.msk.bf16.mxu1 %vm3333_vm3, %v3332_v35 }
0x1af9   :  { %3074 = vmatprep.subr.bf16.mxu1 %v3332_v35 }
0x1afc   :  { %3075 = vmatpush3.bf16.msra.mxu1 %v3407_v47 }
0x1afd   :  { %3088 = vmatprep.subr.bf16.mxu1 %v3332_v35 }
0x1bb7   :  { %v2008_v54 = vpop.f32.mrf.mxu1 }
0x1bb8   :  { %v2009_v26 = vadd.f32 %v2008_v54, %v3394_v25 }
0x1bb9   :  { %v3062_v29 = vpop.f32.mrf.mxu1 }
0x1bba   :  { %v2014_v30 = vmin.f32 %v2009_v26, 20.0 }
0x1bbb   :  { %v2011_v32 = vpop.f32.mrf.mxu1 }
0x1bbc   :  { %v2015_v24 = vmul.f32 1.442695, %v2014_v30 }
0x1bbd   :  { %v3063_v20 = vpop.f32.mrf.mxu1 }
0x1bbe   :  { %3246 = vpow2.f32 %v2015_v24  ;;  %v2180_v24 = vmul.f32 0.3474959, %v3664_v17  ;;  %v2178_v20 = vld [vmem:[#allocation2 + $0x104] sm:$0x3] }
0x1bcb   :  { %v3247_v34 = vpop.eup %3246 }
0x1bcc   :  { %v2017_v38 = vadd.f32 2.0, %v3247_v34 }
0x1bce   :  { %v2018_v39 = vmul.f32 %v3247_v34, %v2017_v38 }
0x1bd0   :  { %v2020_v40 = vadd.f32 2.0, %v2018_v39  ;;  %v2019_v41 = vmul.f32 %v2018_v39, %v2009_v26 }
0x1bd2   :  { %3248 = vrcp.f32 %v2020_v40 }
0x1bdf   :  { %v3249_v48 = vpop.eup %3248 }
0x1be0   :  { %v2022_v42 = vmul.f32 %v3249_v48, %v2019_v41 }
0x1be2   :  { %v2023_v43 = vpack.c.bf16 %v2022_v42, %v2022_v42 }
0x1be4   :  { %3069 = vmatmul.mubr.msk.bf16.vlgmr.msra.gmra.mxu0 %vm142_vm1, %v2023_v43 }
0x1be5   :  { %3081 = vmatpush3.bf16.msra.mxu0 %v3419_v4  ;;  %3084 = vmatprep.mubr.msk.bf16.mxu0 %vm3333_vm3, %v3332_v35 }
0x1be6   :  { %3082 = vmatprep.subr.bf16.mxu0 %v3332_v35 }
0x1be9   :  { %3083 = vmatpush3.bf16.msra.mxu0 %v3423_v7 }
0x1bea   :  { %3094 = vmatprep.subr.bf16.mxu0 %v3332_v35 }
0x1ca4   :  { %v2061_v25 = vpop.f32.mrf.mxu0 }
0x1ca5   :  { %v2062_v45 = vadd.f32 %v3641_v9, %v2061_v25 }
0x1ca6   :  { %v3070_v46 = vpop.f32.mrf.mxu0 }
0x1ca7   :  { %v2067_v49 = vmin.f32 %v2062_v45, 20.0 }
0x1ca8   :  { %v2064_v51 = vpop.f32.mrf.mxu0 }
0x1ca9   :  { %v2068_v31 = vmul.f32 1.442695, %v2067_v49 }
0x1caa   :  { %v3071_v53 = vpop.f32.mrf.mxu0 }
0x1cab   :  { %3250 = vpow2.f32 %v2068_v31 }
0x1cb8   :  { %v3251_v56 = vpop.eup %3250 }
0x1cb9   :  { %v2070_v37 = vadd.f32 2.0, %v3251_v56 }
0x1cbb   :  { %v2071_v57 = vmul.f32 %v3251_v56, %v2070_v37 }
0x1cbd   :  { %v2073_v58 = vadd.f32 2.0, %v2071_v57  ;;  %v2072_v59 = vmul.f32 %v2071_v57, %v2062_v45 }
0x1cbf   :  { %3252 = vrcp.f32 %v2073_v58 }
0x1ccc   :  { %v3253_v8 = vpop.eup %3252 }
0x1ccd   :  { %v2075_v60 = vmul.f32 %v3253_v8, %v2072_v59 }
0x1ccf   :  { %v2076_v61 = vpack.c.bf16 %v2075_v60, %v2075_v60 }
0x1cd1   :  { %3077 = vmatmul.mubr.msk.bf16.vlgmr.msra.gmra.mxu1 %vm142_vm1, %v2076_v61 }
0x1cd2   :  { %3089 = vmatpush3.bf16.msra.mxu1 %v3353_v36  ;;  %3090 = vmatprep.mubr.msk.bf16.mxu1 %vm3333_vm3, %v3332_v35 }
0x1cd3   :  { %3102 = vmatprep.subr.bf16.mxu1 %v3332_v35 }
0x1d91   :  { %v2114_v62 = vpop.f32.mrf.mxu1 }
0x1d92   :  { %v2115_v0 = vadd.f32 %v3649_v21, %v2114_v62 }
0x1d93   :  { %v3078_v50 = vpop.f32.mrf.mxu1 }
0x1d94   :  { %v2120_v1 = vmin.f32 %v2115_v0, 20.0 }
0x1d95   :  { %v2117_v2 = vpop.f32.mrf.mxu1 }
0x1d96   :  { %v2121_v22 = vmul.f32 1.442695, %v2120_v1 }
0x1d97   :  { %v3079_v3 = vpop.f32.mrf.mxu1 }
0x1d98   :  { %3254 = vpow2.f32 %v2121_v22 }
0x1da5   :  { %v3255_v6 = vpop.eup %3254 }
0x1da6   :  { %v2123_v19 = vadd.f32 2.0, %v3255_v6 }
0x1da8   :  { %v2124_v10 = vmul.f32 %v3255_v6, %v2123_v19 }
0x1daa   :  { %v2126_v33 = vadd.f32 2.0, %v2124_v10  ;;  %v2125_v63 = vmul.f32 %v2124_v10, %v2115_v0 }
0x1dac   :  { %3256 = vrcp.f32 %v2126_v33 }
0x1db9   :  { %v3257_v11 = vpop.eup %3256 }
0x1dba   :  { %v2128_v12 = vmul.f32 %v3257_v11, %v2125_v63 }
0x1dbc   :  { %v2129_v13 = vpack.c.bf16 %v2128_v12, %v2128_v12 }
0x1dbe   :  { %3085 = vmatmul.mubr.msk.bf16.vlgmr.msra.gmra.mxu0 %vm142_vm1, %v2129_v13 }
0x1dbf   :  { %3095 = vmatpush3.bf16.msra.mxu0 %v3374_v52  ;;  %3098 = vmatprep.mubr.msk.bf16.mxu0 %vm3333_vm3, %v3332_v35 }
0x1dc0   :  { %3096 = vmatprep.subr.bf16.mxu0 %v3332_v35 }
0x1dc3   :  { %3097 = vmatpush3.bf16.msra.mxu0 %v3377_v55 }
0x1dc4   :  { %3110 = vmatprep.subr.bf16.mxu0 %v3332_v35 }
0x1e7e   :  { %v2167_v14 = vpop.f32.mrf.mxu0 }
0x1e7f   :  { %v2168_v15 = vadd.f32 %v3659_v5, %v2167_v14 }
0x1e80   :  { %v3086_v23 = vpop.f32.mrf.mxu0 }
0x1e81   :  { %v2174_v18 = vmul.f32 0.083488956, %v2168_v15 }
0x1e82   :  { %v2170_v54 = vpop.f32.mrf.mxu0 }
0x1e83   :  { %v2175_v26 = vsub.f32 %v2173_v16, %v2174_v18 }
0x1e84   :  { %v3087_v29 = vpop.f32.mrf.mxu0 }
0x1e85   :  { %v2680_v30 = vclamps-f32 %v2175_v26, 1.0 }
0x1e87   :  { %v2179_v32 = vmul.f32 0.65250605, %v2680_v30 }
0x1e89   :  { %v2181_v34 = vadd.f32 %v2180_v24, %v2179_v32 }
0x1e8b   :  { %v3700_v38 = vadd.f32 %v2181_v34, %v2178_v20 }
0x1e8d   :  { %v2183_v39 = vpack.c.bf16 %v3700_v38, %v3700_v38  ;;  %v2386_v24 = vmul.f32 1.0012076, %v3700_v38 }
0x1e8f   :  { %3091 = vmatmul.mubr.msk.bf16.vlgmr.msra.gmra.mxu1 %vm475_vm4, %v2183_v39 }
0x1e90   :  { %3103 = vmatpush3.bf16.msra.mxu1 %v3403_v44  ;;  %3106 = vmatprep.mubr.msk.bf16.mxu1 %vm3333_vm3, %v3332_v35 }
0x1e91   :  { %3104 = vmatprep.subr.bf16.mxu1 %v3332_v35 }
0x1e94   :  { %3105 = vmatpush3.bf16.msra.mxu1 %v3407_v47 }
0x1e95   :  { %3118 = vmatprep.subr.bf16.mxu1 %v3332_v35 }
0x1f4f   :  { %v2221_v17 = vpop.f32.mrf.mxu1 }
0x1f50   :  { %v2222_v40 = vadd.f32 %v2221_v17, %v3396_v27 }
0x1f51   :  { %v3092_v41 = vpop.f32.mrf.mxu1 }
0x1f52   :  { %v2227_v48 = vmin.f32 %v2222_v40, 20.0  ;;  %v2393_v41 = vmul.f32 0.0414374, %v3700_v38 }
0x1f53   :  { %v2224_v42 = vpop.f32.mrf.mxu1 }
0x1f54   :  { %v2228_v43 = vmul.f32 1.442695, %v2227_v48  ;;  %v2391_v48 = vld [vmem:[#allocation2 + $0x102] sm:$0x3] }
0x1f55   :  { %v3093_v25 = vpop.f32.mrf.mxu1 }
0x1f56   :  { %3258 = vpow2.f32 %v2228_v43 }
0x1f63   :  { %v3259_v45 = vpop.eup %3258 }
0x1f64   :  { %v2230_v46 = vadd.f32 2.0, %v3259_v45 }
0x1f66   :  { %v2231_v49 = vmul.f32 %v3259_v45, %v2230_v46 }
0x1f68   :  { %v2233_v51 = vadd.f32 2.0, %v2231_v49  ;;  %v2232_v31 = vmul.f32 %v2231_v49, %v2222_v40 }
0x1f6a   :  { %3260 = vrcp.f32 %v2233_v51 }
0x1f77   :  { %v3261_v53 = vpop.eup %3260 }
0x1f78   :  { %v2235_v56 = vmul.f32 %v3261_v53, %v2232_v31 }
0x1f7a   :  { %v2236_v37 = vpack.c.bf16 %v2235_v56, %v2235_v56 }
0x1f7c   :  { %3099 = vmatmul.mubr.msk.bf16.vlgmr.msra.gmra.mxu0 %vm142_vm1, %v2236_v37 }
0x1f7d   :  { %3111 = vmatpush3.bf16.msra.mxu0 %v3419_v4  ;;  %3114 = vmatprep.mubr.msk.bf16.mxu0 %vm3333_vm3, %v3332_v35 }
0x1f7e   :  { %3112 = vmatprep.subr.bf16.mxu0 %v3332_v35 }
0x1f81   :  { %3113 = vmatpush3.bf16.msra.mxu0 %v3423_v7 }
0x1f82   :  { %3124 = vmatprep.subr.bf16.mxu0 %v3332_v35 }
0x203c   :  { %v2274_v27 = vpop.f32.mrf.mxu0 }
0x203d   :  { %v2275_v57 = vadd.f32 %v3641_v9, %v2274_v27 }
0x203e   :  { %v3100_v58 = vpop.f32.mrf.mxu0 }
0x203f   :  { %v2280_v59 = vmin.f32 %v2275_v57, 20.0 }
0x2040   :  { %v2277_v8 = vpop.f32.mrf.mxu0 }
0x2041   :  { %v2281_v60 = vmul.f32 1.442695, %v2280_v59 }
0x2042   :  { %v3101_v61 = vpop.f32.mrf.mxu0 }
0x2043   :  { %3262 = vpow2.f32 %v2281_v60 }
0x2050   :  { %v3263_v62 = vpop.eup %3262 }
0x2051   :  { %v2283_v0 = vadd.f32 2.0, %v3263_v62 }
0x2053   :  { %v2284_v50 = vmul.f32 %v3263_v62, %v2283_v0 }
0x2055   :  { %v2286_v1 = vadd.f32 2.0, %v2284_v50  ;;  %v2285_v2 = vmul.f32 %v2284_v50, %v2275_v57 }
0x2057   :  { %3264 = vrcp.f32 %v2286_v1 }
0x2064   :  { %v3265_v22 = vpop.eup %3264 }
0x2065   :  { %v2288_v3 = vmul.f32 %v3265_v22, %v2285_v2 }
0x2067   :  { %v2289_v6 = vpack.c.bf16 %v2288_v3, %v2288_v3 }
0x2069   :  { %3107 = vmatmul.mubr.msk.bf16.vlgmr.msra.gmra.mxu1 %vm142_vm1, %v2289_v6 }
0x206a   :  { %3119 = vmatpush3.bf16.msra.mxu1 %v3353_v36  ;;  %3120 = vmatprep.mubr.msk.bf16.mxu1 %vm3333_vm3, %v3332_v35 }
0x206b   :  { %3132 = vmatprep.subr.bf16.mxu1 %v3332_v35 }
0x2129   :  { %v2327_v19 = vpop.f32.mrf.mxu1 }
0x212a   :  { %v2328_v10 = vadd.f32 %v3649_v21, %v2327_v19 }
0x212b   :  { %v3108_v33 = vpop.f32.mrf.mxu1 }
0x212c   :  { %v2333_v63 = vmin.f32 %v2328_v10, 20.0 }
0x212d   :  { %v2330_v11 = vpop.f32.mrf.mxu1 }
0x212e   :  { %v2334_v12 = vmul.f32 1.442695, %v2333_v63 }
0x212f   :  { %v3109_v13 = vpop.f32.mrf.mxu1 }
0x2130   :  { %3266 = vpow2.f32 %v2334_v12 }
0x213d   :  { %v3267_v14 = vpop.eup %3266 }
0x213e   :  { %v2336_v15 = vadd.f32 2.0, %v3267_v14 }
0x2140   :  { %v2337_v23 = vmul.f32 %v3267_v14, %v2336_v15 }
0x2142   :  { %v2339_v16 = vadd.f32 2.0, %v2337_v23  ;;  %v2338_v36 = vmul.f32 %v2337_v23, %v2328_v10 }
0x2144   :  { %3268 = vrcp.f32 %v2339_v16 }
0x2151   :  { %v3269_v18 = vpop.eup %3268 }
0x2152   :  { %v2341_v54 = vmul.f32 %v3269_v18, %v2338_v36 }
0x2154   :  { %v2342_v26 = vpack.c.bf16 %v2341_v54, %v2341_v54 }
0x2156   :  { %3115 = vmatmul.mubr.msk.bf16.vlgmr.msra.gmra.mxu0 %vm142_vm1, %v2342_v26 }
0x2157   :  { %3125 = vmatpush3.bf16.msra.mxu0 %v3374_v52  ;;  %3128 = vmatprep.mubr.msk.bf16.mxu0 %vm3333_vm3, %v3332_v35 }
0x2158   :  { %3126 = vmatprep.subr.bf16.mxu0 %v3332_v35 }
0x215b   :  { %3127 = vmatpush3.bf16.msra.mxu0 %v3377_v55 }
0x215c   :  { %3140 = vmatprep.subr.bf16.mxu0 %v3332_v35 }
0x2216   :  { %v2380_v29 = vpop.f32.mrf.mxu0 }
0x2217   :  { %v2381_v30 = vadd.f32 %v3659_v5, %v2380_v29 }
0x2218   :  { %v3116_v32 = vpop.f32.mrf.mxu0 }
0x2219   :  { %v2387_v20 = vmul.f32 0.049160246, %v2381_v30 }
0x221a   :  { %v2383_v34 = vpop.f32.mrf.mxu0 }
0x221b   :  { %v2388_v39 = vsub.f32 %v2386_v24, %v2387_v20 }
0x221c   :  { %v3117_v17 = vpop.f32.mrf.mxu0 }
0x221d   :  { %v2685_v52 = vclamps-f32 %v2388_v39, 1.0 }
0x221f   :  { %v2392_v40 = vmul.f32 0.9585659, %v2685_v52  ;;  %v2604_v52 = vld [vmem:[#allocation2 + $0x100] sm:$0x3] }
0x2221   :  { %v2394_v42 = vadd.f32 %v2393_v41, %v2392_v40 }
0x2223   :  { %v3736_v43 = vadd.f32 %v2394_v42, %v2391_v48 }
0x2225   :  { %v2396_v55 = vpack.c.bf16 %v3736_v43, %v3736_v43  ;;  %v2599_v29 = vmul.f32 1.00005, %v3736_v43  ;;  %v2606_v17 = vmul.f32 0.0, %v3736_v43 }
0x2227   :  { %3121 = vmatmul.mubr.msk.bf16.vlgmr.msra.gmra.mxu1 %vm475_vm4, %v2396_v55 }
0x2228   :  { %3133 = vmatpush3.bf16.msra.mxu1 %v3403_v44  ;;  %3136 = vmatprep.mubr.msk.bf16.mxu1 %vm3333_vm3, %v3332_v35 }
0x2229   :  { %3134 = vmatprep.subr.bf16.mxu1 %v3332_v35 }
0x222c   :  { %3135 = vmatpush3.bf16.msra.mxu1 %v3407_v47 }
0x22e7   :  { %v2434_v25 = vpop.f32.mrf.mxu1 }
0x22e8   :  { %v2435_v38 = vadd.f32 %v2434_v25, %v3398_v28 }
0x22e9   :  { %v3122_v45 = vpop.f32.mrf.mxu1 }
0x22ea   :  { %v2440_v46 = vmin.f32 %v2435_v38, 20.0 }
0x22eb   :  { %v2437_v49 = vpop.f32.mrf.mxu1 }
0x22ec   :  { %v2441_v51 = vmul.f32 1.442695, %v2440_v46 }
0x22ed   :  { %v3123_v31 = vpop.f32.mrf.mxu1 }
0x22ee   :  { %3270 = vpow2.f32 %v2441_v51 }
0x22fb   :  { %v3271_v53 = vpop.eup %3270 }
0x22fc   :  { %v2443_v56 = vadd.f32 2.0, %v3271_v53 }
0x22fe   :  { %v2444_v37 = vmul.f32 %v3271_v53, %v2443_v56 }
0x2300   :  { %v2446_v44 = vadd.f32 2.0, %v2444_v37  ;;  %v2445_v27 = vmul.f32 %v2444_v37, %v2435_v38 }
0x2302   :  { %3272 = vrcp.f32 %v2446_v44 }
0x230f   :  { %v3273_v57 = vpop.eup %3272 }
0x2310   :  { %v2448_v58 = vmul.f32 %v3273_v57, %v2445_v27 }
0x2312   :  { %v2449_v59 = vpack.c.bf16 %v2448_v58, %v2448_v58 }
0x2314   :  { %3129 = vmatmul.mubr.msk.bf16.vlgmr.msra.gmra.mxu0 %vm142_vm1, %v2449_v59 }
0x2315   :  { %3141 = vmatpush3.bf16.msra.mxu0 %v3419_v4  ;;  %3144 = vmatprep.mubr.msk.bf16.mxu0 %vm3333_vm3, %v3332_v35 }
0x2316   :  { %3142 = vmatprep.subr.bf16.mxu0 %v3332_v35 }
0x2319   :  { %3143 = vmatpush3.bf16.msra.mxu0 %v3423_v7 }
0x23d4   :  { %v2487_v28 = vpop.f32.mrf.mxu0 }
0x23d5   :  { %v2488_v47 = vadd.f32 %v3641_v9, %v2487_v28 }
0x23d6   :  { %v3130_v8 = vpop.f32.mrf.mxu0 }
0x23d7   :  { %v2493_v60 = vmin.f32 %v2488_v47, 20.0 }
0x23d8   :  { %v2490_v61 = vpop.f32.mrf.mxu0 }
0x23d9   :  { %v2494_v62 = vmul.f32 1.442695, %v2493_v60 }
0x23da   :  { %v3131_v0 = vpop.f32.mrf.mxu0 }
0x23db   :  { %3274 = vpow2.f32 %v2494_v62 }
0x23e8   :  { %v3275_v50 = vpop.eup %3274 }
0x23e9   :  { %v2496_v1 = vadd.f32 2.0, %v3275_v50 }
0x23eb   :  { %v2497_v2 = vmul.f32 %v3275_v50, %v2496_v1 }
0x23ed   :  { %v2499_v4 = vadd.f32 2.0, %v2497_v2  ;;  %v2498_v22 = vmul.f32 %v2497_v2, %v2488_v47 }
0x23ef   :  { %3276 = vrcp.f32 %v2499_v4 }
0x23fc   :  { %v3277_v3 = vpop.eup %3276 }
0x23fd   :  { %v2501_v6 = vmul.f32 %v3277_v3, %v2498_v22 }
0x23ff   :  { %v2502_v35 = vpack.c.bf16 %v2501_v6, %v2501_v6 }
0x2401   :  { %3137 = vmatmul.mubr.msk.bf16.vlgmr.msra.gmra.mxu1 %vm142_vm1, %v2502_v35 }
0x24c1   :  { %v2540_v7 = vpop.f32.mrf.mxu1 }
0x24c2   :  { %v2541_v9 = vadd.f32 %v3649_v21, %v2540_v7 }
0x24c3   :  { %v3138_v19 = vpop.f32.mrf.mxu1 }
0x24c4   :  { %v2546_v10 = vmin.f32 %v2541_v9, 20.0 }
0x24c5   :  { %v2543_v33 = vpop.f32.mrf.mxu1 }
0x24c6   :  { %v2547_v63 = vmul.f32 1.442695, %v2546_v10 }
0x24c7   :  { %v3139_v11 = vpop.f32.mrf.mxu1 }
0x24c8   :  { %3278 = vpow2.f32 %v2547_v63 }
0x24d5   :  { %v3279_v12 = vpop.eup %3278 }
0x24d6   :  { %v2549_v13 = vadd.f32 2.0, %v3279_v12 }
0x24d8   :  { %v2550_v14 = vmul.f32 %v3279_v12, %v2549_v13 }
0x24da   :  { %v2552_v15 = vadd.f32 2.0, %v2550_v14  ;;  %v2551_v23 = vmul.f32 %v2550_v14, %v2541_v9 }
0x24dc   :  { %3280 = vrcp.f32 %v2552_v15 }
0x24e9   :  { %v3281_v16 = vpop.eup %3280 }
0x24ea   :  { %v2554_v36 = vmul.f32 %v3281_v16, %v2551_v23 }
0x24ec   :  { %v2555_v18 = vpack.c.bf16 %v2554_v36, %v2554_v36 }
0x24ee   :  { %3145 = vmatmul.mubr.msk.bf16.vlgmr.msra.gmra.mxu0 %vm142_vm1, %v2555_v18 }
0x25ae   :  { %v2593_v54 = vpop.f32.mrf.mxu0 }
0x25af   :  { %v2594_v21 = vadd.f32 %v3659_v5, %v2593_v54 }
0x25b0   :  { %v3146_v26 = vpop.f32.mrf.mxu0 }
0x25b1   :  { %v2600_v30 = vmul.f32 0.01000083, %v2594_v21 }
0x25b2   :  { %v2596_v32 = vpop.f32.mrf.mxu0 }
0x25b3   :  { %v2601_v24 = vsub.f32 %v2599_v29, %v2600_v30 }
0x25b4   :  { %v3147_v20 = vpop.f32.mrf.mxu0 }
0x25b5   :  { %v2690_v34 = vclamps-f32 %v2601_v24, 1.0 }
0x25b7   :  { %v2605_v39 = vmul.f32 0.99983406, %v2690_v34 }
0x25b9   :  { %v2607_v40 = vadd.f32 %v2606_v17, %v2605_v39 }
0x25bb   :  { %v2608_v41 = vadd.f32 %v2607_v40, %v2604_v52 }
0x25bd   :  { %v2691_v48 = vclamps-f32 %v2608_v41, 1.0 }
0x25bf   :  { %2612 = vst.msk [vmem:[#allocation5] sm:$0x3] %vm2611_vm6, %v2691_v48 }
0x25c0   :  { %3316 = shalt.err (!%p3313_p9)
}
0x25c1   :  { %2622 = dma.vmem_to_hbm [thread:$0]  %s2620_s13, 32, %s3764_s1, [#allocation4]  }
0x25c2   :  { %3327 = dma.done.wait [#allocation4], 32  }
0x25c3   :  { %3328 = vsyncadd [#allocation4], 4294967264 }
0x25c4   :  { %2626 = vsyncpa [#allocation3], 1 }
0x25c5   :  { %2627 = vsyncpa [#allocation4], 1 }

</bundles_post_ra>
